<compile_context>
chip_gen: v7x
topology: tpu7x:2x2x1
jax: 0.10.0
libtpu: 0.0.40
codegen_flags: <defaults>
</compile_context>

<pallas_src>
import functools

import jax
import jax.numpy as jnp
from jax.experimental import pallas as pl
from jax.experimental.pallas import tpu as pltpu

LANE = 128  # pad narrow channel dims to a full lane width


# ----------------------------- Pallas kernel ------------------------------

def _single_net_kernel(x_ref, wc_ref, bc_ref, wl_ref, bl_ref, out_ref, acc_ref,
                       *, th, w, cin, hw):
    """One grid step = one batch element x one tile of TH image rows.

    x_ref   : [1, H+2, W+2, Cin] bf16  spatially padded NHWC image (resident per b)
    wc_ref  : [9, Cin, Cp]       bf16  conv weight, Cp = Cmid padded to 128
    bc_ref  : [1, Cp]            f32   conv bias (zero-padded)
    wl_ref  : [Cp, Dp]           bf16  linear weight, Dp = D padded to 128
    bl_ref  : [1, Dp]            f32   linear bias (zero-padded)
    out_ref : [1, 1, Dp]         f32   L2-normalized embedding for this batch elem
    acc_ref : [1, Cp]            f32   partial global-avg-pool accumulator (scratch)
    """
    t = pl.program_id(1)

    @pl.when(t == 0)
    def _init():
        acc_ref[...] = jnp.zeros_like(acc_ref)

    m = th * w
    cp = wc_ref.shape[2]
    row0 = pl.multiple_of(t * th, th)

    # in-kernel im2col: 3x3 conv (pad=1) as 9 shifted matmuls on the MXU,
    # bf16 operands, f32 accumulation.
    h = jnp.zeros((m, cp), jnp.float32)
    for i in range(9):
        dy, dx = i // 3, i % 3
        v = x_ref[0, pl.ds(row0 + dy, th), dx:dx + w, :]          # [th, w, cin] bf16
        h = h + jnp.dot(v.reshape(m, cin), wc_ref[i],
                        preferred_element_type=jnp.float32)
    h = jnp.maximum(h + bc_ref[...], 0.0)                          # f32 bias + ReLU

    # partial global-average pool: tile row-sum on the (otherwise idle) MXU,
    # bf16 operands with f32 accumulation into the VMEM scratch.
    ones = jnp.ones((1, m), jnp.bfloat16)
    acc_ref[...] += jnp.dot(ones, h.astype(jnp.bfloat16),
                            preferred_element_type=jnp.float32)

    @pl.when(t == pl.num_programs(1) - 1)
    def _finalize():
        pooled = acc_ref[...] * (1.0 / hw)                         # [1, Cp] f32
        emb = jnp.dot(pooled.astype(wl_ref.dtype), wl_ref[...],
                      preferred_element_type=jnp.float32) + bl_ref[...]
        # F.normalize(emb, p=2, dim=1, eps=1e-12): padded cols are exactly 0,
        # so the sum of squares equals the unpadded one.  rsqrt -> EUP slot.
        ssq = jnp.sum(emb * emb, axis=-1, keepdims=True)
        out_ref[0] = emb * jax.lax.rsqrt(jnp.maximum(ssq, 1e-24))


# ------------------------------ JAX wrapper -------------------------------

def _pad_nhwc(x_nchw):
    """NCHW -> NHWC with a 1-pixel spatial zero pad (conv pad=1)."""
    x = jnp.transpose(x_nchw, (0, 2, 3, 1))
    return jnp.pad(x, ((0, 0), (1, 1), (1, 1), (0, 0)))            # [B, H+2, W+2, C]


@functools.partial(jax.jit, static_argnames=("th",))
def _forward_padded(x_nchw, wc_pad, bc_pad, wl_pad, bl_pad, *, th=8):
    """Backbone + F.normalize; all arithmetic inside a single Pallas call."""
    b, cin, hgt, wid = x_nchw.shape
    assert hgt % th == 0, "image height must be divisible by the row-tile height"
    hw = hgt * wid
    cp, dp = wl_pad.shape

    xp = _pad_nhwc(x_nchw).astype(jnp.bfloat16)                    # [B, H+2, W+2, Cin]

    kern = functools.partial(_single_net_kernel, th=th, w=wid, cin=cin, hw=hw)

    cost = pl.CostEstimate(
        flops=int(2 * b * hw * 9 * cin * cp + 2 * b * hw * cp + 2 * b * cp * dp),
        transcendentals=int(b),
        bytes_accessed=int(xp.size * 2 + wc_pad.size * 2 + bc_pad.size * 4
                           + wl_pad.size * 2 + bl_pad.size * 4 + b * dp * 4),
    )

    out = pl.pallas_call(
        kern,
        out_shape=jax.ShapeDtypeStruct((b, 1, dp), jnp.float32),
        grid_spec=pltpu.PrefetchScalarGridSpec(
            num_scalar_prefetch=0,
            grid=(b, hgt // th),                                   # (batch, row tiles)
            in_specs=[
                pl.BlockSpec((1, hgt + 2, wid + 2, cin), lambda bb, tt: (bb, 0, 0, 0)),
                pl.BlockSpec((9, cin, cp), lambda bb, tt: (0, 0, 0)),
                pl.BlockSpec((1, cp), lambda bb, tt: (0, 0)),
                pl.BlockSpec((cp, dp), lambda bb, tt: (0, 0)),
                pl.BlockSpec((1, dp), lambda bb, tt: (0, 0)),
            ],
            out_specs=pl.BlockSpec((1, 1, dp), lambda bb, tt: (bb, 0, 0)),
            scratch_shapes=[pltpu.VMEM((1, cp), jnp.float32)],
        ),
        compiler_params=pltpu.CompilerParams(
            dimension_semantics=("parallel", "arbitrary"),
            vmem_limit_bytes=32 * 1024 * 1024,
        ),
        cost_estimate=cost,
    )(xp, wc_pad, bc_pad, wl_pad, bl_pad)
    return out.reshape(b, dp)


def single_net_forward(x_nchw, params):
    """SingleNet.forward: returns [B, D] unit-norm embeddings."""
    out_pad = _forward_padded(x_nchw, params["wc_pad"], params["bc_pad"],
                              params["wl_pad"], params["bl_pad"])
    return out_pad[:, :params["d"]]


# -------------------------- deterministic params ---------------------------

def init_params(key, cin=4, cmid=8, d=32):
    k1, k2, k3, k4 = jax.random.split(key, 4)
    # PyTorch-layout conv weight [Cmid, Cin, 3, 3]
    w_conv = jax.random.normal(k1, (cmid, cin, 3, 3), jnp.float32) * 0.1
    b_conv = jax.random.normal(k2, (cmid,), jnp.float32) * 0.01
    w_lin = jax.random.normal(k3, (cmid, d), jnp.float32) * 0.1
    b_lin = jax.random.normal(k4, (d,), jnp.float32) * 0.01

    # reorder conv weight to the shifted-view order (dy, dx) x (cin -> cmid)
    wc9 = jnp.transpose(w_conv, (2, 3, 1, 0)).reshape(9, cin, cmid)

    cp = max(LANE, -(-cmid // LANE) * LANE)   # pad Cmid -> 128 lanes
    dp = max(LANE, -(-d // LANE) * LANE)      # pad D    -> 128 lanes

    wc_pad = jnp.zeros((9, cin, cp), jnp.float32).at[:, :, :cmid].set(wc9)
    bc_pad = jnp.zeros((1, cp), jnp.float32).at[:, :cmid].set(b_conv)
    wl_pad = jnp.zeros((cp, dp), jnp.float32).at[:cmid, :d].set(w_lin)
    bl_pad = jnp.zeros((1, dp), jnp.float32).at[:, :d].set(b_lin)

    return dict(
        # kernel-ready (padded, matmul weights in bf16)
        wc_pad=wc_pad.astype(jnp.bfloat16), bc_pad=bc_pad,
        wl_pad=wl_pad.astype(jnp.bfloat16), bl_pad=bl_pad, d=d,
        # unpadded f32 copies for the references
        wc=wc9.reshape(9 * cin, cmid), bc=b_conv.reshape(1, cmid),
        wl=w_lin, bl=b_lin.reshape(1, d),
    )


# ------------------------- pure-JAX reference checks ------------------------

def _im2col(xp):
    """Padded NHWC [B,H+2,W+2,C] -> im2col patches [B*H*W, 9*C] in (dy,dx,c) order."""
    b, hp, wp, c = xp.shape
    h, w = hp - 2, wp - 2
    views = [xp[:, dy:dy + h, dx:dx + w, :] for dy in range(3) for dx in range(3)]
    return jnp.concatenate(views, axis=-1).reshape(b * h * w, 9 * c)


def _reference_f32(x_nchw, p):
    """Exact f32 semantics of the module (backbone + F.normalize)."""
    b, _, h, w = x_nchw.shape
    patches = _im2col(_pad_nhwc(x_nchw))
    hh = jnp.maximum(patches @ p["wc"] + p["bc"], 0.0)
    pooled = hh.reshape(b, h * w, -1).mean(axis=1)
    emb = pooled @ p["wl"] + p["bl"]
    nrm = jnp.sqrt(jnp.sum(emb * emb, axis=-1, keepdims=True))
    return emb / jnp.maximum(nrm, 1e-12)


def _reference_bf16(x_nchw, p):
    """Same bf16-operand / f32-accumulate recipe as the kernel."""
    b, _, h, w = x_nchw.shape
    hw = h * w
    patches = _im2col(_pad_nhwc(x_nchw).astype(jnp.bfloat16))
    wc_flat = p["wc_pad"].reshape(-1, p["wc_pad"].shape[-1])
    hh = jnp.dot(patches, wc_flat, preferred_element_type=jnp.float32)
    hh = jnp.maximum(hh + p["bc_pad"], 0.0)
    hb = hh.astype(jnp.bfloat16).astype(jnp.float32)               # bf16 pool operand
    pooled = jnp.sum(hb.reshape(b, hw, -1), axis=1) / hw
    emb = jnp.dot(pooled.astype(jnp.bfloat16), p["wl_pad"],
                  preferred_element_type=jnp.float32) + p["bl_pad"]
    ssq = jnp.sum(emb * emb, axis=-1, keepdims=True)
    return (emb * jax.lax.rsqrt(jnp.maximum(ssq, 1e-24)))[:, :p["d"]]


# ----------------------------------- main ----------------------------------

if __name__ == "__main__":
    key = jax.random.PRNGKey(0)
    kx, kp = jax.random.split(key)

    B, Cin, H, W = 2, 4, 16, 16          # NCHW, like PyTorch
    x = jax.random.normal(kx, (B, Cin, H, W), jnp.float32)
    params = init_params(kp, cin=Cin, cmid=8, d=32)

    out = single_net_forward(x, params)
    out = jax.block_until_ready(out)

    ref16 = _reference_bf16(x, params)   # same bf16/f32 recipe -> tight check
    ref32 = _reference_f32(x, params)    # exact f32 semantics   -> loose check
    assert out.shape == (B, params["d"])
    assert jnp.allclose(out, ref16, atol=2e-3, rtol=2e-3), "mismatch vs bf16 ref"
    assert jnp.allclose(out, ref32, atol=2e-2, rtol=2e-2), "mismatch vs f32 ref"
    assert jnp.allclose(jnp.linalg.norm(out, axis=1), 1.0, atol=1e-3)

    print("KERNEL_OK")
</pallas_src>

<mosaic_0001>
module attributes {stable_mosaic.version = 11 : i64} {
  func.func @_single_net_kernel(%arg0: i32, %arg1: i32, %arg2: memref<1x18x18x4xbf16, #tpu.memory_space<vmem>>, %arg3: memref<9x4x128xbf16, #tpu.memory_space<vmem>>, %arg4: memref<1x128xf32, #tpu.memory_space<vmem>>, %arg5: memref<128x128xbf16, #tpu.memory_space<vmem>>, %arg6: memref<1x128xf32, #tpu.memory_space<vmem>>, %arg7: memref<1x1x128xf32, #tpu.memory_space<vmem>>, %arg8: memref<1x128xf32, #tpu.memory_space<vmem>>) attributes {dimension_semantics = [#tpu.dimension_semantics<parallel>, #tpu.dimension_semantics<arbitrary>], iteration_bounds = array<i64: 2, 2>, scalar_prefetch = 0 : i64, scratch_operands = 1 : i64, tpu.core_type = #tpu.core_type<tc>, window_params = [{transform_indices = @transform_0, window_bounds = array<i64: 1, 18, 18, 4>}, {pipeline_mode = #tpu.pipeline_mode<synchronous>, transform_indices = @transform_1, window_bounds = array<i64: 9, 4, 128>}, {pipeline_mode = #tpu.pipeline_mode<synchronous>, transform_indices = @transform_2, window_bounds = array<i64: 1, 128>}, {pipeline_mode = #tpu.pipeline_mode<synchronous>, transform_indices = @transform_3, window_bounds = array<i64: 128, 128>}, {pipeline_mode = #tpu.pipeline_mode<synchronous>, transform_indices = @transform_4, window_bounds = array<i64: 1, 128>}, {transform_indices = @transform_5, window_bounds = array<i64: 1, 1, 128>}]} {
    %c0_i32 = arith.constant 0 : i32
    %0 = arith.cmpi eq, %arg1, %c0_i32 : i32
    %1 = arith.extui %0 : i1 to i32
    %c0_i32_0 = arith.constant 0 : i32
    %2 = arith.cmpi ne, %1, %c0_i32_0 : i32
    scf.if %2 {
      %cst_73 = arith.constant 0.000000e+00 : f32
      %101 = vector.broadcast %cst_73 : f32 to vector<1x128xf32>
      %c0_74 = arith.constant 0 : index
      %c0_75 = arith.constant 0 : index
      %102 = vector.load %arg8[%c0_74, %c0_75] : memref<1x128xf32, #tpu.memory_space<vmem>>, vector<1x128xf32>
      tpu.vector_store %arg8[%c0_74, %c0_75], %101 {strides = array<i32>} : memref<1x128xf32, #tpu.memory_space<vmem>>, vector<1x128xf32>,
    } else {
    }
    %c8_i32 = arith.constant 8 : i32
    %3 = arith.muli %arg1, %c8_i32 : i32
    %4 = tpu.assume_multiple %3, 8 : i32
    %cst = arith.constant 0.000000e+00 : f32
    %5 = vector.broadcast %cst : f32 to vector<128x128xf32>
    %c0_i32_1 = arith.constant 0 : i32
    %6 = arith.addi %4, %c0_i32_1 : i32
    %c0 = arith.constant 0 : index
    %7 = arith.index_cast %6 : i32 to index
    %c0_2 = arith.constant 0 : index
    %c0_3 = arith.constant 0 : index
    %8 = vector.load %arg2[%c0, %7, %c0_2, %c0_3] : memref<1x18x18x4xbf16, #tpu.memory_space<vmem>>, vector<1x8x16x4xbf16>
    %9 = vector.shape_cast %8 : vector<1x8x16x4xbf16> to vector<8x16x4xbf16>
    %10 = vector.shape_cast %9 : vector<8x16x4xbf16> to vector<128x4xbf16>
    %c0_4 = arith.constant 0 : index
    %c0_5 = arith.constant 0 : index
    %c0_6 = arith.constant 0 : index
    %11 = vector.load %arg3[%c0_4, %c0_5, %c0_6] : memref<9x4x128xbf16, #tpu.memory_space<vmem>>, vector<1x4x128xbf16>
    %12 = vector.shape_cast %11 : vector<1x4x128xbf16> to vector<4x128xbf16>
    %cst_7 = arith.constant dense<0.000000e+00> : vector<128x128xf32>
    %13 = tpu.matmul %10, %12, %cst_7 {dimension_numbers = #tpu.dot_dimension_numbers<[1], [0], [0], [1], [0, 0, 1, 1], [], []>} : vector<128x4xbf16>, vector<4x128xbf16>, vector<128x128xf32> -> vector<128x128xf32>
    %14 = arith.addf %5, %13 : vector<128x128xf32>
    %c0_i32_8 = arith.constant 0 : i32
    %15 = arith.addi %4, %c0_i32_8 : i32
    %c0_9 = arith.constant 0 : index
    %16 = arith.index_cast %15 : i32 to index
    %c1 = arith.constant 1 : index
    %c0_10 = arith.constant 0 : index
    %17 = vector.load %arg2[%c0_9, %16, %c1, %c0_10] : memref<1x18x18x4xbf16, #tpu.memory_space<vmem>>, vector<1x8x16x4xbf16>
    %18 = vector.shape_cast %17 : vector<1x8x16x4xbf16> to vector<8x16x4xbf16>
    %19 = vector.shape_cast %18 : vector<8x16x4xbf16> to vector<128x4xbf16>
    %c1_11 = arith.constant 1 : index
    %c0_12 = arith.constant 0 : index
    %c0_13 = arith.constant 0 : index
    %20 = vector.load %arg3[%c1_11, %c0_12, %c0_13] : memref<9x4x128xbf16, #tpu.memory_space<vmem>>, vector<1x4x128xbf16>
    %21 = vector.shape_cast %20 : vector<1x4x128xbf16> to vector<4x128xbf16>
    %cst_14 = arith.constant dense<0.000000e+00> : vector<128x128xf32>
    %22 = tpu.matmul %19, %21, %cst_14 {dimension_numbers = #tpu.dot_dimension_numbers<[1], [0], [0], [1], [0, 0, 1, 1], [], []>} : vector<128x4xbf16>, vector<4x128xbf16>, vector<128x128xf32> -> vector<128x128xf32>
    %23 = arith.addf %14, %22 : vector<128x128xf32>
    %c0_i32_15 = arith.constant 0 : i32
    %24 = arith.addi %4, %c0_i32_15 : i32
    %c0_16 = arith.constant 0 : index
    %25 = arith.index_cast %24 : i32 to index
    %c2 = arith.constant 2 : index
    %c0_17 = arith.constant 0 : index
    %26 = vector.load %arg2[%c0_16, %25, %c2, %c0_17] : memref<1x18x18x4xbf16, #tpu.memory_space<vmem>>, vector<1x8x16x4xbf16>
    %27 = vector.shape_cast %26 : vector<1x8x16x4xbf16> to vector<8x16x4xbf16>
    %28 = vector.shape_cast %27 : vector<8x16x4xbf16> to vector<128x4xbf16>
    %c2_18 = arith.constant 2 : index
    %c0_19 = arith.constant 0 : index
    %c0_20 = arith.constant 0 : index
    %29 = vector.load %arg3[%c2_18, %c0_19, %c0_20] : memref<9x4x128xbf16, #tpu.memory_space<vmem>>, vector<1x4x128xbf16>
    %30 = vector.shape_cast %29 : vector<1x4x128xbf16> to vector<4x128xbf16>
    %cst_21 = arith.constant dense<0.000000e+00> : vector<128x128xf32>
    %31 = tpu.matmul %28, %30, %cst_21 {dimension_numbers = #tpu.dot_dimension_numbers<[1], [0], [0], [1], [0, 0, 1, 1], [], []>} : vector<128x4xbf16>, vector<4x128xbf16>, vector<128x128xf32> -> vector<128x128xf32>
    %32 = arith.addf %23, %31 : vector<128x128xf32>
    %c1_i32 = arith.constant 1 : i32
    %33 = arith.addi %4, %c1_i32 : i32
    %c0_22 = arith.constant 0 : index
    %34 = arith.index_cast %33 : i32 to index
    %c0_23 = arith.constant 0 : index
    %c0_24 = arith.constant 0 : index
    %35 = vector.load %arg2[%c0_22, %34, %c0_23, %c0_24] : memref<1x18x18x4xbf16, #tpu.memory_space<vmem>>, vector<1x8x16x4xbf16>
    %36 = vector.shape_cast %35 : vector<1x8x16x4xbf16> to vector<8x16x4xbf16>
    %37 = vector.shape_cast %36 : vector<8x16x4xbf16> to vector<128x4xbf16>
    %c3 = arith.constant 3 : index
    %c0_25 = arith.constant 0 : index
    %c0_26 = arith.constant 0 : index
    %38 = vector.load %arg3[%c3, %c0_25, %c0_26] : memref<9x4x128xbf16, #tpu.memory_space<vmem>>, vector<1x4x128xbf16>
    %39 = vector.shape_cast %38 : vector<1x4x128xbf16> to vector<4x128xbf16>
    %cst_27 = arith.constant dense<0.000000e+00> : vector<128x128xf32>
    %40 = tpu.matmul %37, %39, %cst_27 {dimension_numbers = #tpu.dot_dimension_numbers<[1], [0], [0], [1], [0, 0, 1, 1], [], []>} : vector<128x4xbf16>, vector<4x128xbf16>, vector<128x128xf32> -> vector<128x128xf32>
    %41 = arith.addf %32, %40 : vector<128x128xf32>
    %c1_i32_28 = arith.constant 1 : i32
    %42 = arith.addi %4, %c1_i32_28 : i32
    %c0_29 = arith.constant 0 : index
    %43 = arith.index_cast %42 : i32 to index
    %c1_30 = arith.constant 1 : index
    %c0_31 = arith.constant 0 : index
    %44 = vector.load %arg2[%c0_29, %43, %c1_30, %c0_31] : memref<1x18x18x4xbf16, #tpu.memory_space<vmem>>, vector<1x8x16x4xbf16>
    %45 = vector.shape_cast %44 : vector<1x8x16x4xbf16> to vector<8x16x4xbf16>
    %46 = vector.shape_cast %45 : vector<8x16x4xbf16> to vector<128x4xbf16>
    %c4 = arith.constant 4 : index
    %c0_32 = arith.constant 0 : index
    %c0_33 = arith.constant 0 : index
    %47 = vector.load %arg3[%c4, %c0_32, %c0_33] : memref<9x4x128xbf16, #tpu.memory_space<vmem>>, vector<1x4x128xbf16>
    %48 = vector.shape_cast %47 : vector<1x4x128xbf16> to vector<4x128xbf16>
    %cst_34 = arith.constant dense<0.000000e+00> : vector<128x128xf32>
    %49 = tpu.matmul %46, %48, %cst_34 {dimension_numbers = #tpu.dot_dimension_numbers<[1], [0], [0], [1], [0, 0, 1, 1], [], []>} : vector<128x4xbf16>, vector<4x128xbf16>, vector<128x128xf32> -> vector<128x128xf32>
    %50 = arith.addf %41, %49 : vector<128x128xf32>
    %c1_i32_35 = arith.constant 1 : i32
    %51 = arith.addi %4, %c1_i32_35 : i32
    %c0_36 = arith.constant 0 : index
    %52 = arith.index_cast %51 : i32 to index
    %c2_37 = arith.constant 2 : index
    %c0_38 = arith.constant 0 : index
    %53 = vector.load %arg2[%c0_36, %52, %c2_37, %c0_38] : memref<1x18x18x4xbf16, #tpu.memory_space<vmem>>, vector<1x8x16x4xbf16>
    %54 = vector.shape_cast %53 : vector<1x8x16x4xbf16> to vector<8x16x4xbf16>
    %55 = vector.shape_cast %54 : vector<8x16x4xbf16> to vector<128x4xbf16>
    %c5 = arith.constant 5 : index
    %c0_39 = arith.constant 0 : index
    %c0_40 = arith.constant 0 : index
    %56 = vector.load %arg3[%c5, %c0_39, %c0_40] : memref<9x4x128xbf16, #tpu.memory_space<vmem>>, vector<1x4x128xbf16>
    %57 = vector.shape_cast %56 : vector<1x4x128xbf16> to vector<4x128xbf16>
    %cst_41 = arith.constant dense<0.000000e+00> : vector<128x128xf32>
    %58 = tpu.matmul %55, %57, %cst_41 {dimension_numbers = #tpu.dot_dimension_numbers<[1], [0], [0], [1], [0, 0, 1, 1], [], []>} : vector<128x4xbf16>, vector<4x128xbf16>, vector<128x128xf32> -> vector<128x128xf32>
    %59 = arith.addf %50, %58 : vector<128x128xf32>
    %c2_i32 = arith.constant 2 : i32
    %60 = arith.addi %4, %c2_i32 : i32
    %c0_42 = arith.constant 0 : index
    %61 = arith.index_cast %60 : i32 to index
    %c0_43 = arith.constant 0 : index
    %c0_44 = arith.constant 0 : index
    %62 = vector.load %arg2[%c0_42, %61, %c0_43, %c0_44] : memref<1x18x18x4xbf16, #tpu.memory_space<vmem>>, vector<1x8x16x4xbf16>
    %63 = vector.shape_cast %62 : vector<1x8x16x4xbf16> to vector<8x16x4xbf16>
    %64 = vector.shape_cast %63 : vector<8x16x4xbf16> to vector<128x4xbf16>
    %c6 = arith.constant 6 : index
    %c0_45 = arith.constant 0 : index
    %c0_46 = arith.constant 0 : index
    %65 = vector.load %arg3[%c6, %c0_45, %c0_46] : memref<9x4x128xbf16, #tpu.memory_space<vmem>>, vector<1x4x128xbf16>
    %66 = vector.shape_cast %65 : vector<1x4x128xbf16> to vector<4x128xbf16>
    %cst_47 = arith.constant dense<0.000000e+00> : vector<128x128xf32>
    %67 = tpu.matmul %64, %66, %cst_47 {dimension_numbers = #tpu.dot_dimension_numbers<[1], [0], [0], [1], [0, 0, 1, 1], [], []>} : vector<128x4xbf16>, vector<4x128xbf16>, vector<128x128xf32> -> vector<128x128xf32>
    %68 = arith.addf %59, %67 : vector<128x128xf32>
    %c2_i32_48 = arith.constant 2 : i32
    %69 = arith.addi %4, %c2_i32_48 : i32
    %c0_49 = arith.constant 0 : index
    %70 = arith.index_cast %69 : i32 to index
    %c1_50 = arith.constant 1 : index
    %c0_51 = arith.constant 0 : index
    %71 = vector.load %arg2[%c0_49, %70, %c1_50, %c0_51] : memref<1x18x18x4xbf16, #tpu.memory_space<vmem>>, vector<1x8x16x4xbf16>
    %72 = vector.shape_cast %71 : vector<1x8x16x4xbf16> to vector<8x16x4xbf16>
    %73 = vector.shape_cast %72 : vector<8x16x4xbf16> to vector<128x4xbf16>
    %c7 = arith.constant 7 : index
    %c0_52 = arith.constant 0 : index
    %c0_53 = arith.constant 0 : index
    %74 = vector.load %arg3[%c7, %c0_52, %c0_53] : memref<9x4x128xbf16, #tpu.memory_space<vmem>>, vector<1x4x128xbf16>
    %75 = vector.shape_cast %74 : vector<1x4x128xbf16> to vector<4x128xbf16>
    %cst_54 = arith.constant dense<0.000000e+00> : vector<128x128xf32>
    %76 = tpu.matmul %73, %75, %cst_54 {dimension_numbers = #tpu.dot_dimension_numbers<[1], [0], [0], [1], [0, 0, 1, 1], [], []>} : vector<128x4xbf16>, vector<4x128xbf16>, vector<128x128xf32> -> vector<128x128xf32>
    %77 = arith.addf %68, %76 : vector<128x128xf32>
    %c2_i32_55 = arith.constant 2 : i32
    %78 = arith.addi %4, %c2_i32_55 : i32
    %c0_56 = arith.constant 0 : index
    %79 = arith.index_cast %78 : i32 to index
    %c2_57 = arith.constant 2 : index
    %c0_58 = arith.constant 0 : index
    %80 = vector.load %arg2[%c0_56, %79, %c2_57, %c0_58] : memref<1x18x18x4xbf16, #tpu.memory_space<vmem>>, vector<1x8x16x4xbf16>
    %81 = vector.shape_cast %80 : vector<1x8x16x4xbf16> to vector<8x16x4xbf16>
    %82 = vector.shape_cast %81 : vector<8x16x4xbf16> to vector<128x4xbf16>
    %c8 = arith.constant 8 : index
    %c0_59 = arith.constant 0 : index
    %c0_60 = arith.constant 0 : index
    %83 = vector.load %arg3[%c8, %c0_59, %c0_60] : memref<9x4x128xbf16, #tpu.memory_space<vmem>>, vector<1x4x128xbf16>
    %84 = vector.shape_cast %83 : vector<1x4x128xbf16> to vector<4x128xbf16>
    %cst_61 = arith.constant dense<0.000000e+00> : vector<128x128xf32>
    %85 = tpu.matmul %82, %84, %cst_61 {dimension_numbers = #tpu.dot_dimension_numbers<[1], [0], [0], [1], [0, 0, 1, 1], [], []>} : vector<128x4xbf16>, vector<4x128xbf16>, vector<128x128xf32> -> vector<128x128xf32>
    %86 = arith.addf %77, %85 : vector<128x128xf32>
    %c0_62 = arith.constant 0 : index
    %c0_63 = arith.constant 0 : index
    %87 = vector.load %arg4[%c0_62, %c0_63] : memref<1x128xf32, #tpu.memory_space<vmem>>, vector<1x128xf32>
    %88 = vector.broadcast %87 : vector<1x128xf32> to vector<128x128xf32>
    %89 = arith.addf %86, %88 : vector<128x128xf32>
    %cst_64 = arith.constant 0.000000e+00 : f32
    %90 = vector.broadcast %cst_64 : f32 to vector<128x128xf32>
    %91 = arith.maximumf %89, %90 : vector<128x128xf32>
    %cst_65 = arith.constant 1.000000e+00 : bf16
    %92 = vector.broadcast %cst_65 : bf16 to vector<1x128xbf16>
    %c0_66 = arith.constant 0 : index
    %c0_67 = arith.constant 0 : index
    %93 = vector.load %arg8[%c0_66, %c0_67] : memref<1x128xf32, #tpu.memory_space<vmem>>, vector<1x128xf32>
    %94 = arith.truncf %91 : vector<128x128xf32> to vector<128x128xbf16>
    %cst_68 = arith.constant dense<0.000000e+00> : vector<1x128xf32>
    %95 = tpu.matmul %92, %94, %cst_68 {dimension_numbers = #tpu.dot_dimension_numbers<[1], [0], [0], [1], [0, 0, 1, 1], [], []>} : vector<1x128xbf16>, vector<128x128xbf16>, vector<1x128xf32> -> vector<1x128xf32>
    %96 = arith.addf %93, %95 : vector<1x128xf32>
    %c0_69 = arith.constant 0 : index
    %c0_70 = arith.constant 0 : index
    %97 = vector.load %arg8[%c0_69, %c0_70] : memref<1x128xf32, #tpu.memory_space<vmem>>, vector<1x128xf32>
    tpu.vector_store %arg8[%c0_69, %c0_70], %96 {strides = array<i32>} : memref<1x128xf32, #tpu.memory_space<vmem>>, vector<1x128xf32>,
    %c1_i32_71 = arith.constant 1 : i32
    %98 = arith.cmpi eq, %arg1, %c1_i32_71 : i32
    %99 = arith.extui %98 : i1 to i32
    %c0_i32_72 = arith.constant 0 : i32
    %100 = arith.cmpi ne, %99, %c0_i32_72 : i32
    scf.if %100 {
      %c0_73 = arith.constant 0 : index
      %c0_74 = arith.constant 0 : index
      %101 = vector.load %arg8[%c0_73, %c0_74] : memref<1x128xf32, #tpu.memory_space<vmem>>, vector<1x128xf32>
      %cst_75 = arith.constant 3.906250e-03 : f32
      %102 = vector.broadcast %cst_75 : f32 to vector<1x128xf32>
      %103 = arith.mulf %101, %102 : vector<1x128xf32>
      %104 = arith.truncf %103 : vector<1x128xf32> to vector<1x128xbf16>
      %c0_76 = arith.constant 0 : index
      %c0_77 = arith.constant 0 : index
      %105 = vector.load %arg5[%c0_76, %c0_77] : memref<128x128xbf16, #tpu.memory_space<vmem>>, vector<128x128xbf16>
      %cst_78 = arith.constant dense<0.000000e+00> : vector<1x128xf32>
      %106 = tpu.matmul %104, %105, %cst_78 {dimension_numbers = #tpu.dot_dimension_numbers<[1], [0], [0], [1], [0, 0, 1, 1], [], []>} : vector<1x128xbf16>, vector<128x128xbf16>, vector<1x128xf32> -> vector<1x128xf32>
      %c0_79 = arith.constant 0 : index
      %c0_80 = arith.constant 0 : index
      %107 = vector.load %arg6[%c0_79, %c0_80] : memref<1x128xf32, #tpu.memory_space<vmem>>, vector<1x128xf32>
      %108 = arith.addf %106, %107 : vector<1x128xf32>
      %109 = arith.mulf %108, %108 : vector<1x128xf32>
      %cst_81 = arith.constant dense<0.000000e+00> : vector<1xf32>
      %110 = vector.multi_reduction <add>, %109, %cst_81 [1] : vector<1x128xf32> to vector<1xf32>
      %111 = vector.shape_cast %110 : vector<1xf32> to vector<1x1xf32>
      %cst_82 = arith.constant 1.000000e-24 : f32
      %112 = vector.broadcast %cst_82 : f32 to vector<1x1xf32>
      %113 = arith.maximumf %111, %112 : vector<1x1xf32>
      %114 = math.rsqrt %113 : vector<1x1xf32>
      %115 = vector.broadcast %114 : vector<1x1xf32> to vector<1x128xf32>
      %116 = arith.mulf %108, %115 : vector<1x128xf32>
      %c0_83 = arith.constant 0 : index
      %c0_84 = arith.constant 0 : index
      %c0_85 = arith.constant 0 : index
      %117 = vector.load %arg7[%c0_83, %c0_84, %c0_85] : memref<1x1x128xf32, #tpu.memory_space<vmem>>, vector<1x1x128xf32>
      %118 = vector.shape_cast %117 : vector<1x1x128xf32> to vector<1x128xf32>
      %119 = vector.shape_cast %116 : vector<1x128xf32> to vector<1x1x128xf32>
      tpu.vector_store %arg7[%c0_83, %c0_84, %c0_85], %119 {strides = array<i32>} : memref<1x1x128xf32, #tpu.memory_space<vmem>>, vector<1x1x128xf32>,
    } else {
    }
    return
  }
  func.func @transform_0(%arg0: i32, %arg1: i32) -> (i32, i32, i32, i32) {
    %c0_i32 = arith.constant 0 : i32
    %c0_i32_0 = arith.constant 0 : i32
    %c0_i32_1 = arith.constant 0 : i32
    %c0_i32_2 = arith.constant 0 : i32
    return %arg0, %c0_i32, %c0_i32_0, %c0_i32_1 : i32, i32, i32, i32
  }
  func.func @transform_1(%arg0: i32, %arg1: i32) -> (i32, i32, i32) {
    %c0_i32 = arith.constant 0 : i32
    %c0_i32_0 = arith.constant 0 : i32
    %c0_i32_1 = arith.constant 0 : i32
    %c0_i32_2 = arith.constant 0 : i32
    return %c0_i32, %c0_i32_0, %c0_i32_1 : i32, i32, i32
  }
  func.func @transform_2(%arg0: i32, %arg1: i32) -> (i32, i32) {
    %c0_i32 = arith.constant 0 : i32
    %c0_i32_0 = arith.constant 0 : i32
    %c0_i32_1 = arith.constant 0 : i32
    return %c0_i32, %c0_i32_0 : i32, i32
  }
  func.func @transform_3(%arg0: i32, %arg1: i32) -> (i32, i32) {
    %c0_i32 = arith.constant 0 : i32
    %c0_i32_0 = arith.constant 0 : i32
    %c0_i32_1 = arith.constant 0 : i32
    return %c0_i32, %c0_i32_0 : i32, i32
  }
  func.func @transform_4(%arg0: i32, %arg1: i32) -> (i32, i32) {
    %c0_i32 = arith.constant 0 : i32
    %c0_i32_0 = arith.constant 0 : i32
    %c0_i32_1 = arith.constant 0 : i32
    return %c0_i32, %c0_i32_0 : i32, i32
  }
  func.func @transform_5(%arg0: i32, %arg1: i32) -> (i32, i32, i32) {
    %c0_i32 = arith.constant 0 : i32
    %c0_i32_0 = arith.constant 0 : i32
    %c0_i32_1 = arith.constant 0 : i32
    return %arg0, %c0_i32, %c0_i32_0 : i32, i32, i32
  }
}

</mosaic_0001>

<bundles_post_ra>
// kernel: _forward_padded.1
= control target key start
LH: loop header
LB: loop body
LE: loop exit
PB: predicated region body
PF: predicated region fallthrough
CT: control target
= control target key end

     0   :  { %10 = vsyncpa [#allocation4], 0  ;;  %s5036_s0 = inlined_call_operand.vmem [shape: bf16[2,18,18,4], index: 0, kind: input, shape index: {}]   ;;  %s5037_s1 = inlined_call_operand.vmem [shape: bf16[9,4,128], index: 1, kind: input, shape index: {}]   ;;  %s5038_s2 = inlined_call_operand.vmem [shape: f32[1,128], index: 2, kind: input, shape index: {}]   ;;  %s5039_s3 = inlined_call_operand.vmem [shape: bf16[128,128], index: 3, kind: input, shape index: {}]   ;;  %s5040_s4 = inlined_call_operand.vmem [shape: f32[1,128], index: 4, kind: input, shape index: {}]   ;;  %s5041_s5 = inlined_call_operand.hbm [shape: f32[2,1,128], index: 5, kind: output, shape index: {}]  }
   0x1   :  { %12 = vsyncpa [#allocation4 + $0x1], 0  ;;  %s3989_s18 = smov 0   ;;  %s3991_s19 = smov 0  }
   0x2   :  { %s3993_s20 = smov 0   ;;  %s3995_s21 = smov 0  }
   0x3   :  { %s3997_s22 = smov 0   ;;  %s3999_s23 = smov 0  }
   0x4   :  { %s4001_s24 = smov 0   ;;  %s4003_s25 = smov 0  }
   0x5 LB: > { %s3006_s26 = sadd.s32 4294967295, %s3950_s25   ;;  %s3007_s27 = sadd.s32 4294967294, %s3950_s25   ;;  %s3950_s25 = sphi %s4003_s25, %s18_s25   ;;  %s3946_s24 = sphi %s4001_s24, %s5070_s24   ;;  %s3942_s23 = sphi %s3999_s23, %s5069_s23   ;;  %s3938_s22 = sphi %s3997_s22, %s5068_s22   ;;  %s3934_s21 = sphi %s3995_s21, %s5067_s21   ;;  %s3930_s20 = sphi %s3993_s20, %s5066_s20   ;;  %s3926_s19 = sphi %s3991_s19, %s5065_s19   ;;  %s3922_s18 = sphi %s3989_s18, %s5064_s18  }
   0x6   : > { %s27_s28 = sadd.s32 1, %s3942_s23  ;;  %s30_s29 = sadd.s32 1, %s3946_s24 }
   0x7   : > { %p28_p0 = scmp.ge.s32.totalorder %s27_s28, 2  ;;  %p157_p1 = scmp.ne.s32.totalorder %s3930_s20, %s3926_s19 }
   0x8   : > { %p158_p2 = scmp.eq.s32.totalorder %s3006_s26, 3  ;;  %p163_p4 = scmp.ne.s32.totalorder %s3926_s19, %s3922_s18 }
   0x9   : > { %s5072_s28 = smov (%p28_p0, %s27_s28), 0  ;;  %s5074_s29 = smov (!%p28_p0, %s30_s29), %s3946_s24 }
   0xa   : > { %p4038_p3 = por %p158_p2, %p157_p1  ;;  %p32_p5 = scmp.ge.s32.totalorder %s5074_s29, 2 }
   0xb   : > { %p164_p6 = scmp.eq.s32.totalorder %s3007_s27, 3  ;;  %p3010_p7 = scmp.ge.s32.totalorder %s3950_s25, 1 }
   0xc   : > { %p202_p8 = scmp.lt.s32.totalorder %s3950_s25, 5  ;;  %s5076_s29 = smov (%p32_p5, %s5074_s29), 0 }
   0xd   : > { %p4048_p9 = por %p164_p6, %p163_p4  ;;  %s144_s7 = ssub.s32 %s3946_s24, %s5076_s29 }
   0xe   : > { %p203_p10 = pnand %p3010_p7, %p202_p8  ;;  %s147_s8 = sadd.s32 1, %s3930_s20 }
   0xf   : > { %p145_p11 = scmp.eq.s32.totalorder %s144_s7, 0 }
  0x10   : > { %206 = sbr.rel (%p203_p10) target bundleno = 1097 (0x449), region = 40 }
  0x11   : > { %s4056_s9 = scalar_select %p145_p11, %s3930_s20, %s147_s8  }
  0x17   : > { %s227_s10 = sand.u32 1, %s3926_s19   ;;  %p229_p12 = scmp.lt.s32.totalorder %s3938_s22, 1 }
  0x18   : > { %s4066_s16 = scalar_lea.vmem [#allocation3], %s227_s10  ;;  %p3012_p13 = scmp.ne.s32.totalorder %s3934_s21, 0 }
  0x19   : > { %s230_s11 = scalar_select %p229_p12, %s3938_s22, 1 }
  0x1a   : > { %239 = sbr.rel (%p3012_p13) target bundleno = 33 (0x21), region = 44  ;;  %v3952_v0 = vmov (!%p3012_p13), 0.0  }
  0x1b   : > { %s3744_s12 = smul.u32 216, %s230_s11  ;;  %240 = vst [vmem:[#allocation2] sm:$0x1] (!%p3012_p13), %v3952_v0 }
  0x1d   : > { %s233_s15 = scalar_lea.vmem %s5036_s0, %s3744_s12 }
  0x21 PF: > { %v3016_v1 = vld [vmem:[%s5037_s1 + $0x2] sm:$0x3]  ;;  %vm516_vm0 = vcmask 1041408   ;;  %v3133_v2 = vld [vmem:[%s5037_s1 + $0x8] sm:$0x3]  ;;  %s3305_s8 = smul.u32 96, %s3934_s21 }
  0x22   : > { %3735 = vmatprep.subr.msk.bf16.mxu1 %vm516_vm0, %v3016_v1  ;;  %3739 = vmatprep.subr.msk.bf16.mxu0 %vm516_vm0, %v3133_v2  ;;  %v518_v3 = vsel %vm516_vm0, %v3016_v1, 0  ;;  %v1499_v4 = vsel %vm516_vm0, %v3133_v2, 0  ;;  %vm270_vm1 = vsmask.f32 3328  ;;  %vm271_vm2 = vsmask.f32 7440 }
  0x23   : > { %3406 = vmatpush3.bf16.msra.mxu1 %v518_v3  ;;  %3478 = vmatpush3.bf16.msra.mxu0 %v1499_v4  ;;  %s4080_s11 = scalar_lea.vmem %s233_s15, %s3305_s8  ;;  %v4085_v5 = vld [vmem:[%s5037_s1 + $0xa] sm:$0x3]  ;;  %v4090_v6 = vld [vmem:[%s5037_s1] sm:$0x3]  ;;  %vm4125_vm3 = vmor %vm270_vm1, %vm271_vm2  ;;  %vm491_vm4 = vcmask 31744   ;;  %vm805_vm5 = vcmask 1042432  }
  0x24   : > { %v4093_v7 = vld [vmem:[%s4080_s11] sm:$0xf]  ;;  %v4096_v8 = vld [vmem:[%s4080_s11 + $0x4] sm:$0xf]  ;;  %v4099_v9 = vld [vmem:[%s4080_s11 + $0x8] sm:$0x1]  ;;  %3740 = vmatprep.subr.msk.bf16.mxu0 %vm516_vm0, %v4085_v5  ;;  %3736 = vmatprep.subr.msk.bf16.mxu1 %vm516_vm0, %v4090_v6 }
  0x25   : > { %v274_v10 = vshrl.u32 %v4093_v7, 16  ;;  %v277_v11 = vshll.u32 %v4093_v7, 16  ;;  %v283_v12 = vshll.u32 %v4096_v8, 16  ;;  %v287_v13 = vshrl.u32 %v4096_v8, 16  ;;  %v3109_v14 = vld [vmem:[%s4080_s11 + $0xc] sm:$0xf] }
  0x26   : > { %v293_v15 = vshll.u32 %v4099_v9, 16  ;;  %v4112_v16 = vld [vmem:[%s4080_s11 + $0x10] sm:$0xf]  ;;  %v4115_v17 = vld [vmem:[%s4080_s11 + $0x14] sm:$0x1]  ;;  %v1257_v23 = vshrl.u32 %v3109_v14, 16 }
  0x27   : > { %v276_v18 = vrot.slane %v274_v10, 4  ;;  %v279_v19 = vrot.slane %v277_v11, 5  ;;  %v285_v20 = vrot.slane %v283_v12, 5  ;;  %v289_v21 = vrot.slane %v287_v13, 4  ;;  %v4121_v30 = vld [vmem:[%s4080_s11 + $0xc] sm:$0xf] }
  0x28   : > { %v295_v22 = vrot.slane %v293_v15, 5  ;;  %v1260_v24 = vshll.u32 %v3109_v14, 16  ;;  %v1266_v25 = vshll.u32 %v4112_v16, 16  ;;  %v1270_v28 = vshrl.u32 %v4112_v16, 16  ;;  %v4130_v35 = vld [vmem:[%s4080_s11 + $0x10] sm:$0xf] }
  0x29   : > { %v280_v26 = vor.u32 %v279_v19, %v276_v18  ;;  %v290_v27 = vor.u32 %v289_v21, %v285_v20  ;;  %v1276_v29 = vshll.u32 %v4115_v17, 16  ;;  %v1259_v32 = vrot.slane %v1257_v23, 4  ;;  %v4133_v41 = vld [vmem:[%s4080_s11 + $0x14] sm:$0x1]  ;;  %v3112_v52 = vld [vmem:[%s4080_s11 + $0x18] sm:$0xf] }
  0x2a   : > { %v1262_v33 = vrot.slane %v1260_v24, 5  ;;  %v1268_v34 = vrot.slane %v1266_v25, 5  ;;  %v1272_v38 = vrot.slane %v1270_v28, 4  ;;  %v298_v42 = vshrl.u32 %v4121_v30, 16  ;;  %v4146_v57 = vld [vmem:[%s4080_s11 + $0x1c] sm:$0xf] }
  0x2b   : > { %v281_v36 = vrot.slane %v280_v26, 4  ;;  %v291_v37 = vrot.slane %v290_v27, 4  ;;  %v1278_v40 = vrot.slane %v1276_v29, 5  ;;  %v301_v43 = vshll.u32 %v4121_v30, 16  ;;  %v4153_v61 = vld [vmem:[%s4080_s11 + $0x20] sm:$0x1] }
  0x2c   : > { %v1263_v39 = vor.u32 %v1262_v33, %v1259_v32  ;;  %v1273_v46 = vor.u32 %v1272_v38, %v1268_v34  ;;  %v307_v47 = vshll.u32 %v4130_v35, 16  ;;  %v300_v50 = vrot.slane %v298_v42, 4  ;;  %v4163_v18 = vld [vmem:[%s4080_s11 + $0x18] sm:$0xf]  ;;  %v4170_v23 = vld [vmem:[%s4080_s11 + $0x1c] sm:$0xf] }
  0x2d   : > { %v286_v44 = vsel %vm4125_vm3, %v281_v36, %v285_v20  ;;  %v296_v45 = vsel %vm4125_vm3, %v291_v37, %v295_v22  ;;  %v303_v51 = vrot.slane %v301_v43, 5  ;;  %v311_v55 = vshrl.u32 %v4130_v35, 16  ;;  %v4177_v33 = vld [vmem:[%s4080_s11 + $0x20] sm:$0x1]  ;;  %p3293_p0 = scmp.ne.s32.totalorder %s3934_s21, 1 }
  0x2e   : > { %v3017_v48 = vcombine.low %v286_v44, %v296_v45  ;;  %v1264_v49 = vrot.slane %v1263_v39, 4  ;;  %v1274_v53 = vrot.slane %v1273_v46, 4  ;;  %v309_v54 = vrot.slane %v307_v47, 5  ;;  %5049 = vst [vmem:[#allocation6_spill] sm:$0xff] %v4177_v33 }
  0x2f   : > { %v317_v56 = vshll.u32 %v4133_v41, 16  ;;  %v304_v60 = vor.u32 %v303_v51, %v300_v50  ;;  %v313_v0 = vrot.slane %v311_v55, 4  ;;  %v1281_v2 = vshrl.u32 %v3112_v52, 16 }
  0x30   : > { %3407 = vmatprep.mubr.msk.bf16.mxu1 %vm491_vm4, %v3017_v48  ;;  %v1269_v58 = vsel %vm4125_vm3, %v1264_v49, %v1268_v34  ;;  %v1279_v63 = vsel %vm4125_vm3, %v1274_v53, %v1278_v40  ;;  %v1284_v10 = vshll.u32 %v3112_v52, 16  ;;  %v1290_v11 = vshll.u32 %v4146_v57, 16  ;;  %v3115_v40 = vld [vmem:[%s4080_s11 + $0x24] sm:$0xf]  ;;  %v4194_v52 = vld [vmem:[%s4080_s11 + $0x2c] sm:$0x1] }
  0x31   : > { %v319_v1 = vrot.slane %v317_v56, 5  ;;  %v3134_v3 = vcombine.low %v1269_v58, %v1279_v63  ;;  %v305_v4 = vrot.slane %v304_v60, 4  ;;  %v314_v12 = vor.u32 %v313_v0, %v309_v54  ;;  %v4200_v63 = vld [vmem:[%s4080_s11 + $0x24] sm:$0xf] }
  0x32   : > { %v1283_v13 = vrot.slane %v1281_v2, 4  ;;  %v1294_v14 = vshrl.u32 %v4146_v57, 16  ;;  %v1300_v15 = vshll.u32 %v4153_v61, 16  ;;  %v1286_v21 = vrot.slane %v1284_v10, 5 }
  0x33   : > { %3479 = vmatprep.mubr.msk.bf16.mxu0 %vm491_vm4, %v3134_v3  ;;  %v310_v20 = vsel %vm4125_vm3, %v305_v4, %v309_v54  ;;  %v1292_v22 = vrot.slane %v1290_v11, 5  ;;  %v315_v24 = vrot.slane %v314_v12, 4  ;;  %v1753_v32 = vsel %vm516_vm0, %v4085_v5, 0  ;;  %v4187_v5 = vld [vmem:[%s4080_s11 + $0x28] sm:$0xf] }
  0x34   : > { %v1296_v25 = vrot.slane %v1294_v14, 4  ;;  %v1302_v26 = vrot.slane %v1300_v15, 5  ;;  %v1287_v28 = vor.u32 %v1286_v21, %v1283_v13  ;;  %v322_v34 = vshrl.u32 %v4163_v18, 16  ;;  %v4203_v4 = vld [vmem:[%s4080_s11 + $0x28] sm:$0xf] }
  0x35   : > { %v320_v36 = vsel %vm4125_vm3, %v315_v24, %v319_v1  ;;  %v325_v38 = vshll.u32 %v4163_v18, 16  ;;  %v331_v39 = vshll.u32 %v4170_v23, 16  ;;  %v335_v45 = vshrl.u32 %v4170_v23, 16 }
  0x36   : > { %v1297_v37 = vor.u32 %v1296_v25, %v1292_v22  ;;  %v3018_v42 = vcombine.low %v310_v20, %v320_v36  ;;  %v1288_v43 = vrot.slane %v1287_v28, 4  ;;  %v324_v44 = vrot.slane %v322_v34, 4  ;;  %v4209_v20 = vld [vmem:[%s4080_s11 + $0x2c] sm:$0x1]  ;;  %v3118_v34 = vld [vmem:[%s4080_s11 + $0x30] sm:$0xf] }
  0x37   : > { %v327_v47 = vrot.slane %v325_v38, 5  ;;  %v333_v48 = vrot.slane %v331_v39, 5  ;;  %v341_v49 = vshll.u32 %v4177_v33, 16  ;;  %v337_v51 = vrot.slane %v335_v45, 4 }
  0x38   : > { %v1298_v46 = vrot.slane %v1297_v37, 4  ;;  %3408 = vmatmul.mubr.msk.bf16.vlgmr.msra.gmra.mrb[0].mxu1 %vm491_vm4, %v3018_v42  ;;  %v1293_v50 = vsel %vm4125_vm3, %v1288_v43, %v1292_v22  ;;  %v1305_v53 = vshrl.u32 %v3115_v40, 16  ;;  %v1308_v54 = vshll.u32 %v3115_v40, 16  ;;  %v4220_v40 = vld [vmem:[%s4080_s11 + $0x34] sm:$0xf] }
  0x39   : > { %v328_v56 = vor.u32 %v327_v47, %v324_v44  ;;  %v343_v58 = vrot.slane %v341_v49, 5  ;;  %v1314_v60 = vshll.u32 %v4187_v5, 16  ;;  %v338_v1 = vor.u32 %v337_v51, %v333_v48  ;;  %v4228_v51 = vld [vmem:[%s4080_s11 + $0x38] sm:$0x1] }
  0x3a   : > { %v1303_v55 = vsel %vm4125_vm3, %v1298_v46, %v1302_v26  ;;  %v1307_v2 = vrot.slane %v1305_v53, 4  ;;  %v1310_v3 = vrot.slane %v1308_v54, 5  ;;  %v1318_v12 = vshrl.u32 %v4187_v5, 16 }
  0x3b   : > { %v3135_v0 = vcombine.low %v1293_v50, %v1303_v55  ;;  %v329_v10 = vrot.slane %v328_v56, 4  ;;  %v1316_v11 = vrot.slane %v1314_v60, 5  ;;  %v1324_v13 = vshll.u32 %v4194_v52, 16 }
  0x3c   : > { %v339_v14 = vrot.slane %v338_v1, 4  ;;  %v1311_v15 = vor.u32 %v1310_v3, %v1307_v2  ;;  %v346_v21 = vshrl.u32 %v4200_v63, 16  ;;  %v349_v22 = vshll.u32 %v4200_v63, 16 }
  0x3d   : > { %3480 = vmatmul.mubr.msk.bf16.vlgmr.msra.gmra.mrb[0].mxu0 %vm491_vm4, %v3135_v0  ;;  %v334_v24 = vsel %vm4125_vm3, %v329_v10, %v333_v48  ;;  %v1320_v25 = vrot.slane %v1318_v12, 4  ;;  %v1326_v26 = vrot.slane %v1324_v13, 5  ;;  %v355_v28 = vshll.u32 %v4203_v4, 16  ;;  %v4233_v0 = vld [vmem:[%s4080_s11 + $0x30] sm:$0xf] }
  0x3e   : > { %3496 = vmatpush3.bf16.msra.mxu0 %v1753_v32  ;;  %v344_v36 = vsel %vm4125_vm3, %v339_v14, %v343_v58  ;;  %v1312_v37 = vrot.slane %v1311_v15, 4  ;;  %v348_v38 = vrot.slane %v346_v21, 4  ;;  %v351_v39 = vrot.slane %v349_v22, 5  ;;  %v4244_v21 = vld [vmem:[%s4080_s11 + $0x38] sm:$0x1] }
  0x3f   : > { %v3019_v42 = vcombine.low %v334_v24, %v344_v36  ;;  %v1321_v43 = vor.u32 %v1320_v25, %v1316_v11  ;;  %v357_v32 = vrot.slane %v355_v28, 5  ;;  %v359_v44 = vshrl.u32 %v4203_v4, 16  ;;  %v3121_v28 = vld [vmem:[%s4080_s11 + $0x3c] sm:$0xf] }
  0x40   : > { %v1317_v45 = vsel %vm4125_vm3, %v1312_v37, %v1316_v11  ;;  %v352_v46 = vor.u32 %v351_v39, %v348_v38  ;;  %v365_v47 = vshll.u32 %v4209_v20, 16  ;;  %v1329_v48 = vshrl.u32 %v3118_v34, 16  ;;  %v4238_v11 = vld [vmem:[%s4080_s11 + $0x34] sm:$0xf]  ;;  %v4253_v39 = vld [vmem:[%s4080_s11 + $0x40] sm:$0xf] }
  0x41   : > { %3411 = vmatprep.mubr.msk.bf16.mxu1 %vm491_vm4, %v3019_v42  ;;  %v1322_v49 = vrot.slane %v1321_v43, 4  ;;  %v361_v50 = vrot.slane %v359_v44, 4  ;;  %v1332_v53 = vshll.u32 %v3118_v34, 16  ;;  %v1338_v54 = vshll.u32 %v4220_v40, 16 }
  0x42   : > { %v353_v55 = vrot.slane %v352_v46, 4  ;;  %v367_v56 = vrot.slane %v365_v47, 5  ;;  %v1331_v58 = vrot.slane %v1329_v48, 4  ;;  %v1342_v60 = vshrl.u32 %v4220_v40, 16 }
  0x43   : > { %v1327_v1 = vsel %vm4125_vm3, %v1322_v49, %v1326_v26  ;;  %v362_v2 = vor.u32 %v361_v50, %v357_v32  ;;  %v1334_v3 = vrot.slane %v1332_v53, 5  ;;  %v1340_v10 = vrot.slane %v1338_v54, 5 }
  0x44   : > { %v3136_v12 = vcombine.low %v1317_v45, %v1327_v1  ;;  %v358_v13 = vsel %vm4125_vm3, %v353_v55, %v357_v32  ;;  %v1344_v14 = vrot.slane %v1342_v60, 4  ;;  %v1348_v15 = vshll.u32 %v4228_v51, 16  ;;  %v4260_v45 = vld [vmem:[%s5037_s1 + $0xc] sm:$0x3]  ;;  %v4271_v60 = vld [vmem:[%s4080_s11 + $0x44] sm:$0x1] }
  0x45   : > { %v363_v22 = vrot.slane %v362_v2, 4  ;;  %v1335_v24 = vor.u32 %v1334_v3, %v1331_v58  ;;  %v370_v25 = vshrl.u32 %v4233_v0, 16  ;;  %v373_v26 = vshll.u32 %v4233_v0, 16  ;;  %3741 = vmatprep.subr.msk.bf16.mxu0 %vm516_vm0, %v4260_v45  ;;  %v4275_v3 = vld [vmem:[%s4080_s11 + $0x3c] sm:$0xf] }
  0x46   : > { %3483 = vmatprep.mubr.msk.bf16.mxu0 %vm491_vm4, %v3136_v12  ;;  %v1345_v34 = vor.u32 %v1344_v14, %v1340_v10  ;;  %v1350_v36 = vrot.slane %v1348_v15, 5  ;;  %v379_v37 = vshll.u32 %v4238_v11, 16  ;;  %v383_v38 = vshrl.u32 %v4238_v11, 16  ;;  %v4278_v15 = vld [vmem:[%s4080_s11 + $0x40] sm:$0xf] }
  0x47   : > { %v368_v42 = vsel %vm4125_vm3, %v363_v22, %v367_v56  ;;  %v1336_v43 = vrot.slane %v1335_v24, 4  ;;  %v372_v32 = vrot.slane %v370_v25, 4  ;;  %v375_v44 = vrot.slane %v373_v26, 5 }
  0x48   : > { %v3020_v46 = vcombine.low %v358_v13, %v368_v42  ;;  %v1346_v47 = vrot.slane %v1345_v34, 4  ;;  %v381_v48 = vrot.slane %v379_v37, 5  ;;  %v385_v49 = vrot.slane %v383_v38, 4  ;;  %v4282_v34 = vld [vmem:[%s4080_s11 + $0x44] sm:$0x1] }
  0x49   : > { %v1341_v50 = vsel %vm4125_vm3, %v1336_v43, %v1340_v10  ;;  %v376_v53 = vor.u32 %v375_v44, %v372_v32  ;;  %v389_v54 = vshll.u32 %v4244_v21, 16  ;;  %v1353_v55 = vshrl.u32 %v3121_v28, 16  ;;  %v3124_v42 = vld [vmem:[%s4080_s11 + $0x48] sm:$0xf] }
  0x4a   : > { %3412 = vmatmul.mubr.msk.bf16.gmra.mrb[4].mxu1 %vm491_vm4, %v3020_v46  ;;  %v1351_v56 = vsel %vm4125_vm3, %v1346_v47, %v1350_v36  ;;  %v386_v58 = vor.u32 %v385_v49, %v381_v48  ;;  %v1356_v1 = vshll.u32 %v3121_v28, 16  ;;  %v1362_v2 = vshll.u32 %v4253_v39, 16 }
  0x4b   : > { %v3137_v10 = vcombine.low %v1341_v50, %v1351_v56  ;;  %v377_v12 = vrot.slane %v376_v53, 4  ;;  %v391_v13 = vrot.slane %v389_v54, 5  ;;  %v1355_v14 = vrot.slane %v1353_v55, 4 }
  0x4c   : > { %v387_v22 = vrot.slane %v386_v58, 4  ;;  %v1358_v24 = vrot.slane %v1356_v1, 5  ;;  %v1364_v25 = vrot.slane %v1362_v2, 5  ;;  %v1366_v26 = vshrl.u32 %v4253_v39, 16  ;;  %v4299_v1 = vld [vmem:[%s4080_s11 + $0x50] sm:$0x1] }
  0x4d   : > { %3484 = vmatmul.mubr.msk.bf16.gmra.mrb[4].mxu0 %vm491_vm4, %v3137_v10  ;;  %v382_v28 = vsel %vm4125_vm3, %v377_v12, %v381_v48  ;;  %v1372_v36 = vshll.u32 %v4271_v60, 16  ;;  %v394_v37 = vshrl.u32 %v4275_v3, 16  ;;  %v397_v38 = vshll.u32 %v4275_v3, 16  ;;  %v4295_v48 = vld [vmem:[%s4080_s11 + $0x4c] sm:$0xf] }
  0x4e   : > { %v392_v43 = vsel %vm4125_vm3, %v387_v22, %v391_v13  ;;  %v1359_v32 = vor.u32 %v1358_v24, %v1355_v14  ;;  %v1368_v44 = vrot.slane %v1366_v26, 4  ;;  %v403_v46 = vshll.u32 %v4278_v15, 16 }
  0x4f   : > { %v3021_v47 = vcombine.low %v382_v28, %v392_v43  ;;  %v1374_v49 = vrot.slane %v1372_v36, 5  ;;  %v396_v50 = vrot.slane %v394_v37, 4  ;;  %v399_v53 = vrot.slane %v397_v38, 5  ;;  %v4307_v28 = vld [vmem:[%s4080_s11 + $0x48] sm:$0xf] }
  0x50   : > { %v1360_v54 = vrot.slane %v1359_v32, 4  ;;  %v1369_v55 = vor.u32 %v1368_v44, %v1364_v25  ;;  %v405_v56 = vrot.slane %v403_v46, 5  ;;  %v407_v58 = vshrl.u32 %v4278_v15, 16  ;;  %v4310_v32 = vld [vmem:[%s4080_s11 + $0x4c] sm:$0xf] }
  0x51   : > { %3415 = vmatprep.mubr.msk.bf16.mxu1 %vm491_vm4, %v3021_v47  ;;  %v400_v2 = vor.u32 %v399_v53, %v396_v50  ;;  %v413_v10 = vshll.u32 %v4282_v34, 16  ;;  %v1377_v12 = vshrl.u32 %v3124_v42, 16  ;;  %v1380_v13 = vshll.u32 %v3124_v42, 16 }
  0x52   : > { %v1365_v14 = vsel %vm4125_vm3, %v1360_v54, %v1364_v25  ;;  %v1370_v22 = vrot.slane %v1369_v55, 4  ;;  %v409_v24 = vrot.slane %v407_v58, 4  ;;  %v1386_v26 = vshll.u32 %v4295_v48, 16  ;;  %v4319_v55 = vld [vmem:[%s4080_s11 + $0x50] sm:$0x1] }
  0x53   : > { %v401_v36 = vrot.slane %v400_v2, 4  ;;  %v415_v37 = vrot.slane %v413_v10, 5  ;;  %v1379_v38 = vrot.slane %v1377_v12, 4  ;;  %v1382_v43 = vrot.slane %v1380_v13, 5  ;;  %v3127_v58 = vld [vmem:[%s4080_s11 + $0x54] sm:$0xf] }
  0x54   : > { %v1375_v42 = vsel %vm4125_vm3, %v1370_v22, %v1374_v49  ;;  %v410_v44 = vor.u32 %v409_v24, %v405_v56  ;;  %v1388_v46 = vrot.slane %v1386_v26, 5  ;;  %v1390_v25 = vshrl.u32 %v4295_v48, 16  ;;  %v4328_v24 = vld [vmem:[%s4080_s11 + $0x58] sm:$0xf] }
  0x55   : > { %v3138_v47 = vcombine.low %v1365_v14, %v1375_v42  ;;  %v406_v50 = vsel %vm4125_vm3, %v401_v36, %v405_v56  ;;  %v1383_v53 = vor.u32 %v1382_v43, %v1379_v38  ;;  %v1396_v54 = vshll.u32 %v4299_v1, 16 }
  0x56   : > { %v411_v2 = vrot.slane %v410_v44, 4  ;;  %v1392_v10 = vrot.slane %v1390_v25, 4  ;;  %v418_v12 = vshrl.u32 %v4307_v28, 16  ;;  %v421_v49 = vshll.u32 %v4307_v28, 16 }
  0x57   : > { %3487 = vmatprep.mubr.msk.bf16.mxu0 %vm491_vm4, %v3138_v47  ;;  %v1384_v13 = vrot.slane %v1383_v53, 4  ;;  %v1398_v14 = vrot.slane %v1396_v54, 5  ;;  %v427_v56 = vshll.u32 %v4310_v32, 16  ;;  %v431_v22 = vshrl.u32 %v4310_v32, 16  ;;  %v4335_v53 = vld [vmem:[%s4080_s11 + $0x5c] sm:$0x1] }
  0x58   : > { %v416_v26 = vsel %vm4125_vm3, %v411_v2, %v415_v37  ;;  %v1393_v36 = vor.u32 %v1392_v10, %v1388_v46  ;;  %v420_v38 = vrot.slane %v418_v12, 4  ;;  %v423_v43 = vrot.slane %v421_v49, 5  ;;  %v4338_v54 = vld [vmem:[%s4080_s11 + $0x54] sm:$0xf]  ;;  %v4345_v12 = vld [vmem:[%s4080_s11 + $0x58] sm:$0xf] }
  0x59   : > { %v3022_v42 = vcombine.low %v406_v50, %v416_v26  ;;  %v1389_v44 = vsel %vm4125_vm3, %v1384_v13, %v1388_v46  ;;  %v429_v25 = vrot.slane %v427_v56, 5  ;;  %v433_v47 = vrot.slane %v431_v22, 4  ;;  %5050 = vst [vmem:[#allocation7_spill] sm:$0xff] %v4338_v54 }
  0x5a   : > { %v1394_v29 = vrot.slane %v1393_v36, 4  ;;  %v424_v62 = vor.u32 %v423_v43, %v420_v38  ;;  %v437_v19 = vshll.u32 %v4319_v55, 16  ;;  %v1401_v37 = vshrl.u32 %v3127_v58, 16 }
  0x5b   : > { %3416 = vmatmul.mubr.msk.bf16.gmra.mrb[8].mxu1 %vm491_vm4, %v3022_v42  ;;  %v434_v2 = vor.u32 %v433_v47, %v429_v25  ;;  %v1404_v10 = vshll.u32 %v3127_v58, 16  ;;  %v1410_v50 = vshll.u32 %v4328_v24, 16  ;;  %v1414_v46 = vshrl.u32 %v4328_v24, 16  ;;  %v4350_v42 = vld [vmem:[%s4080_s11 + $0x5c] sm:$0x1] }
  0x5c   : > { %v1399_v49 = vsel %vm4125_vm3, %v1394_v29, %v1398_v14  ;;  %v425_v13 = vrot.slane %v424_v62, 4  ;;  %v439_v56 = vrot.slane %v437_v19, 5  ;;  %v1403_v22 = vrot.slane %v1401_v37, 4  ;;  %5051 = vst [vmem:[#allocation8_spill] sm:$0xff] %v4350_v42  ;;  %v3130_v29 = vld [vmem:[%s4080_s11 + $0x60] sm:$0xf] }
  0x5d   : > { %v3139_v26 = vcombine.low %v1389_v44, %v1399_v49  ;;  %v435_v36 = vrot.slane %v434_v2, 4  ;;  %v1406_v38 = vrot.slane %v1404_v10, 5  ;;  %v1412_v43 = vrot.slane %v1410_v50, 5  ;;  %v4363_v50 = vld [vmem:[%s4080_s11 + $0x64] sm:$0xf] }
  0x5e   : > { %v430_v58 = vsel %vm4125_vm3, %v425_v13, %v429_v25  ;;  %v1416_v47 = vrot.slane %v1414_v46, 4  ;;  %v1420_v59 = vshll.u32 %v4335_v53, 16  ;;  %v442_v27 = vshrl.u32 %v4338_v54, 16 }
  0x5f   : > { %3488 = vmatmul.mubr.msk.bf16.gmra.mrb[8].mxu0 %vm491_vm4, %v3139_v26  ;;  %v440_v62 = vsel %vm4125_vm3, %v435_v36, %v439_v56  ;;  %v1407_v19 = vor.u32 %v1406_v38, %v1403_v22  ;;  %v445_v14 = vshll.u32 %v4338_v54, 16  ;;  %v451_v44 = vshll.u32 %v4345_v12, 16 }
  0x60   : > { %v3023_v37 = vcombine.low %v430_v58, %v440_v62  ;;  %v1417_v2 = vor.u32 %v1416_v47, %v1412_v43  ;;  %v1422_v25 = vrot.slane %v1420_v59, 5  ;;  %v444_v10 = vrot.slane %v442_v27, 4  ;;  %v4371_v47 = vld [vmem:[%s4080_s11 + $0x68] sm:$0x1] }
  0x61   : > { %v1408_v46 = vrot.slane %v1407_v19, 4  ;;  %v447_v49 = vrot.slane %v445_v14, 5  ;;  %v453_v13 = vrot.slane %v451_v44, 5  ;;  %v455_v26 = vshrl.u32 %v4345_v12, 16  ;;  %v3150_v19 = vld [vmem:[%s4080_s11 + $0xc] sm:$0xe] }
  0x62   : > { %3419 = vmatprep.mubr.msk.bf16.mxu1 %vm491_vm4, %v3023_v37  ;;  %v1418_v56 = vrot.slane %v1417_v2, 4  ;;  %v461_v22 = vshll.u32 %v4350_v42, 16  ;;  %v1425_v36 = vshrl.u32 %v3130_v29, 16  ;;  %v1428_v38 = vshll.u32 %v3130_v29, 16 }
  0x63   : > { %v1413_v58 = vsel %vm4125_vm3, %v1408_v46, %v1412_v43  ;;  %v448_v59 = vor.u32 %v447_v49, %v444_v10  ;;  %v457_v27 = vrot.slane %v455_v26, 4  ;;  %v1434_v62 = vshll.u32 %v4363_v50, 16  ;;  %v4380_v43 = vld [vmem:[%s5037_s1 + $0x4] sm:$0x3]  ;;  %v3151_v26 = vld [vmem:[%s4080_s11 + $0x18] sm:$0xe] }
  0x64   : > { %v1423_v14 = vsel %vm4125_vm3, %v1418_v56, %v1422_v25  ;;  %v463_v44 = vrot.slane %v461_v22, 5  ;;  %v1427_v37 = vrot.slane %v1425_v36, 4  ;;  %v1430_v2 = vrot.slane %v1428_v38, 5 }
  0x65   : > { %v3140_v33 = vcombine.low %v1413_v58, %v1423_v14  ;;  %v449_v54 = vrot.slane %v448_v59, 4  ;;  %v458_v29 = vor.u32 %v457_v27, %v453_v13  ;;  %v1436_v42 = vrot.slane %v1434_v62, 5 }
  0x66   : > { %v1431_v10 = vor.u32 %v1430_v2, %v1427_v37  ;;  %v1438_v46 = vshrl.u32 %v4363_v50, 16  ;;  %v1444_v49 = vshll.u32 %v4371_v47, 16  ;;  %v682_v25 = vsel %vm516_vm0, %v4090_v6, 0 }
  0x67   : > { %3491 = vmatprep.mubr.msk.bf16.mxu0 %vm491_vm4, %v3140_v33  ;;  %v454_v56 = vsel %vm4125_vm3, %v449_v54, %v453_v13  ;;  %v459_v22 = vrot.slane %v458_v29, 4  ;;  %3424 = vmatpush3.bf16.msra.mxu1 %v682_v25  ;;  %vm806_vm6 = vcmask 1046532   ;;  %v3158_v36 = vrot.slane %v3150_v19, 9 }
  0x68   : > { %v5052_v38 = vrot.slane %v4146_v57, 5  ;;  %v1432_v59 = vrot.slane %v1431_v10, 4  ;;  %v1440_v27 = vrot.slane %v1438_v46, 4  ;;  %vm4393_vm7 = vmor %vm805_vm5, %vm806_vm6  ;;  %v5055_v6 = vrot.slane %v4112_v16, 5  ;;  %3737 = vmatprep.subr.msk.bf16.mxu1 %vm516_vm0, %v4380_v43 }
  0x69   : > { %v464_v54 = vsel %vm4125_vm3, %v459_v22, %v463_v44  ;;  %v3034_v14 = vcombine.low %v4121_v30, %v4130_v35  ;;  %v3159_v37 = vrot.slane %v3151_v26, 9  ;;  %v1446_v10 = vrot.slane %v1444_v49, 5  ;;  %v3153_v30 = vld [vmem:[%s4080_s11 + $0x30] sm:$0xe] }
  0x6a   : > { %v1657_v58 = vrot.slane %v5052_v38, 4  ;;  %v1650_v33 = vrot.slane %v5055_v6, 4  ;;  %v5056_v13 = vmov %v5055_v6  ;;  %v3024_v2 = vcombine.low %v454_v56, %v464_v54  ;;  %v3152_v6 = vld [vmem:[%s4080_s11 + $0x24] sm:$0xe] }
  0x6b   : > { %v1649_v19 = vsel %vm4393_vm7, %v3158_v36, %v5056_v13  ;;  %v1441_v29 = vor.u32 %v1440_v27, %v1436_v42  ;;  %v5057_v46 = vrot.slane %v4115_v17, 5  ;;  %v1437_v16 = vsel %vm4125_vm3, %v1432_v59, %v1436_v42 }
  0x6c   : > { %3420 = vmatmul.mubr.msk.bf16.gmra.mrb[12].mxu1 %vm491_vm4, %v3024_v2  ;;  %v5058_v26 = vcombine.low %v4093_v7, %v4096_v8  ;;  %v5059_v17 = vrot.slane %v4146_v57, 5  ;;  %v1662_v56 = vrot.slane %v4187_v5, 5  ;;  %v5060_v42 = vrot.slane %v4153_v61, 5  ;;  %v3154_v5 = vld [vmem:[%s4080_s11 + $0x3c] sm:$0xe] }
  0x6d   : > { %v1652_v25 = vsel %vm4393_vm7, %v1650_v33, %v5057_v46  ;;  %v1442_v44 = vrot.slane %v1441_v29, 4  ;;  %v3160_v59 = vrot.slane %v3152_v6, 9  ;;  %v1669_v7 = vrot.slane %v4220_v40, 5  ;;  %v3156_v29 = vld [vmem:[%s4080_s11 + $0x54] sm:$0xe] }
  0x6e   : > { %v3167_v38 = vcombine.low %v1649_v19, %v1652_v25  ;;  %3425 = vmatprep.mubr.msk.bf16.mxu1 %vm491_vm4, %v5058_v26  ;;  %v1656_v49 = vsel %vm4393_vm7, %v3159_v37, %v5059_v17  ;;  %v1659_v36 = vsel %vm4393_vm7, %v1657_v58, %v5060_v42  ;;  %v1664_v33 = vrot.slane %v1662_v56, 4  ;;  %v3155_v37 = vld [vmem:[%s4080_s11 + $0x48] sm:$0xe]  ;;  %v782_v46 = vld [vmem:[%s4080_s11 + $0xc] sm:$0xe] }
  0x6f   : > { %v1447_v22 = vsel %vm4125_vm3, %v1442_v44, %v1446_v10  ;;  %v1665_v57 = vrot.slane %v4194_v52, 5  ;;  %v3161_v54 = vrot.slane %v3153_v30, 9  ;;  %v1672_v13 = vrot.slane %v4228_v51, 5 }
  0x70   : > { %v3141_v27 = vcombine.low %v1437_v16, %v1447_v22  ;;  %v1676_v19 = vrot.slane %v4253_v39, 5  ;;  %v3035_v61 = vcombine.low %v4163_v18, %v4170_v23  ;;  %v1671_v58 = vrot.slane %v1669_v7, 4 }
  0x71   : > { %v1683_v40 = vrot.slane %v4295_v48, 5  ;;  %v817_v2 = vrot.slane %v4130_v35, 5  ;;  %v820_v52 = vrot.slane %v4133_v41, 5  ;;  %v3168_v51 = vcombine.low %v1656_v49, %v1659_v36 }
  0x72   : > { %3492 = vmatmul.mubr.msk.bf16.gmra.mrb[12].mxu0 %vm491_vm4, %v3141_v27  ;;  %v1955_v39 = vsel %vm516_vm0, %v4260_v45, 0  ;;  %v1663_v10 = vsel %vm4393_vm7, %v3160_v59, %v1662_v56  ;;  %v1666_v18 = vsel %vm4393_vm7, %v1664_v33, %v1665_v57  ;;  %v4455_v48 = vsel %vm4393_vm7, %v3161_v54, %v1669_v7  ;;  %v4506_v27 = vld [vmem:[%s4080_s11 + $0x60] sm:$0xe]  ;;  %v784_v33 = vld [vmem:[%s4080_s11 + $0x24] sm:$0xe] }
  0x73   : > { %3497 = vmatprep.mubr.msk.bf16.mxu0 %vm491_vm4, %v3167_v38  ;;  %v3162_v35 = vrot.slane %v3154_v5, 9  ;;  %v1678_v41 = vrot.slane %v1676_v19, 4  ;;  %v1679_v25 = vrot.slane %v4271_v60, 5  ;;  %v3163_v38 = vrot.slane %v3155_v37, 9 }
  0x74   : > { %3426 = vmatmul.mubr.msk.bf16.vlgmr.msra.gmra.mrb[0].mxu1 %vm491_vm4, %v3034_v14  ;;  %v1690_v45 = vrot.slane %v4328_v24, 5  ;;  %v4464_v6 = vsel %vm4393_vm7, %v1671_v58, %v1672_v13  ;;  %v1685_v16 = vrot.slane %v1683_v40, 4  ;;  %v1686_v44 = vrot.slane %v4299_v1, 5  ;;  %v4470_v14 = vld [vmem:[%s5037_s1 + $0x6] sm:$0x3] }
  0x75   : > { %3429 = vmatprep.mubr.msk.bf16.mxu1 %vm491_vm4, %v3035_v61  ;;  %v3164_v30 = vrot.slane %v3156_v29, 9  ;;  %v3169_v26 = vcombine.low %v1663_v10, %v1666_v18  ;;  %v3036_v60 = vcombine.low %v4200_v63, %v4203_v4  ;;  %v1693_v17 = vrot.slane %v4335_v53, 5  ;;  %v781_v13 = vld [vmem:[%s4080_s11] sm:$0xe]  ;;  %v786_v29 = vld [vmem:[%s4080_s11 + $0x3c] sm:$0xe] }
  0x76   : > { %v1692_v24 = vrot.slane %v1690_v45, 4  ;;  %v3037_v49 = vcombine.low %v4233_v0, %v4238_v11  ;;  %v1677_v1 = vsel %vm4393_vm7, %v3162_v35, %v1676_v19  ;;  %v3038_v56 = vcombine.low %v4275_v3, %v4278_v15  ;;  %v4490_v0 = vld [vmem:[%s5037_s1 + $0xe] sm:$0x3] }
  0x77   : > { %v915_v22 = vsel %vm516_vm0, %v4380_v43, 0  ;;  %v3170_v63 = vcombine.low %v4455_v48, %v4464_v6  ;;  %v1680_v42 = vsel %vm4393_vm7, %v1678_v41, %v1679_v25  ;;  %v3050_v53 = vrot.slane %v782_v46, 9  ;;  %v787_v25 = vld [vmem:[%s4080_s11 + $0x48] sm:$0xe] }
  0x78   : > { %3442 = vmatpush3.bf16.msra.mxu1 %v915_v22  ;;  %v819_v36 = vrot.slane %v817_v2, 4  ;;  %v4495_v43 = vsel %vm4393_vm7, %v3163_v38, %v1683_v40  ;;  %v4499_v59 = vsel %vm4393_vm7, %v1685_v16, %v1686_v44  ;;  %v4503_v7 = vsel %vm4393_vm7, %v3164_v30, %v1690_v45 }
  0x79   : > { %3738 = vmatprep.subr.msk.bf16.mxu1 %vm516_vm0, %v4470_v14  ;;  %v813_v57 = vrot.slane %v4099_v9, 5  ;;  %v4515_v54 = vsel %vm4393_vm7, %v1692_v24, %v1693_v17  ;;  %v4520_v5 = vsel %vm4393_vm7, %v3050_v53, %v817_v2  ;;  %v3171_v37 = vcombine.low %v1677_v1, %v1680_v42 }
  0x7a   : > { %3498 = vmatmul.mubr.msk.bf16.vlgmr.msra.gmra.mrb[0].mxu0 %vm491_vm4, %v3168_v51  ;;  %v4524_v19 = vsel %vm4393_vm7, %v819_v36, %v820_v52  ;;  %v3039_v61 = vcombine.low %v4307_v28, %v4310_v32  ;;  %v1697_v58 = vrot.slane %v4363_v50, 5  ;;  %v785_v51 = vld [vmem:[%s4080_s11 + $0x30] sm:$0xe]  ;;  %v3172_v2 = vcombine.low %v4495_v43, %v4499_v59 }
  0x7b   : > { %3514 = vmatpush3.bf16.msra.mxu0 %v1955_v39  ;;  %3501 = vmatprep.mubr.msk.bf16.mxu0 %vm491_vm4, %v3169_v26  ;;  %v3059_v40 = vcombine.low %v4520_v5, %v4524_v19  ;;  %v3165_v52 = vrot.slane %v4506_v27, 9  ;;  %v810_v39 = vrot.slane %v4096_v8, 5  ;;  %v3052_v28 = vrot.slane %v784_v33, 9  ;;  %v5061_v43 = vld [vmem:[#allocation8_spill] sm:$0xff]  ;;  %v4661_v5 = vld [vmem:[%s5037_s1 + $0x10] sm:$0x3] }
  0x7c   : > { %3742 = vmatprep.subr.msk.bf16.mxu0 %vm516_vm0, %v4490_v0  ;;  %3430 = vmatmul.mubr.msk.bf16.gmra.mrb[4].mxu1 %vm491_vm4, %v3036_v60  ;;  %v3173_v50 = vcombine.low %v4503_v7, %v4515_v54  ;;  %v1700_v10 = vrot.slane %v4371_v47, 5  ;;  %v3049_v18 = vrot.slane %v781_v13, 9  ;;  %v831_v48 = vrot.slane %v4203_v4, 5  ;;  %v788_v60 = vld [vmem:[%s4080_s11 + $0x54] sm:$0xe]  ;;  %v5062_v13 = vld [vmem:[#allocation7_spill] sm:$0xff] }
  0x7d   : > { %3433 = vmatprep.mubr.msk.bf16.mxu1 %vm491_vm4, %v3037_v49  ;;  %v834_v35 = vrot.slane %v4209_v20, 5  ;;  %v3053_v46 = vrot.slane %v785_v51, 9  ;;  %v838_v41 = vrot.slane %v4238_v11, 5  ;;  %v841_v8 = vrot.slane %v4244_v21, 5  ;;  %v783_v54 = vld [vmem:[%s4080_s11 + $0x18] sm:$0xe] }
  0x7e   : > { %v1699_v38 = vrot.slane %v1697_v58, 4  ;;  %v4551_v45 = vsel %vm4393_vm7, %v3052_v28, %v831_v48  ;;  %v833_v6 = vrot.slane %v831_v48, 4  ;;  %v3054_v16 = vrot.slane %v786_v29, 9  ;;  %v5063_v29 = vld [vmem:[#allocation6_spill] sm:$0xff] }
  0x7f   : > { %v812_v47 = vrot.slane %v810_v39, 4  ;;  %v4555_v4 = vsel %vm4393_vm7, %v3053_v46, %v838_v41  ;;  %v840_v20 = vrot.slane %v838_v41, 4  ;;  %v845_v44 = vrot.slane %v4278_v15, 5  ;;  %v3831_v46 = vld [vmem:[%s4080_s11 + $0x24] sm:$0xff]   ;;  %v3832_v41 = vld [vmem:[%s4080_s11 + $0x30] sm:$0xff]  }
  0x80   : > { %v4561_v11 = vsel %vm4393_vm7, %v833_v6, %v834_v35  ;;  %v848_v21 = vrot.slane %v4282_v34, 5  ;;  %v3055_v30 = vrot.slane %v787_v25, 9  ;;  %v852_v26 = vrot.slane %v4310_v32, 5  ;;  %v3218_v35 = vld [vmem:[%s4080_s11 + $0x18] sm:$0xf] }
  0x81   : > { %v3061_v24 = vcombine.low %v4551_v45, %v4561_v11  ;;  %v4571_v17 = vsel %vm4393_vm7, %v840_v20, %v841_v8  ;;  %v4575_v49 = vsel %vm4393_vm7, %v3054_v16, %v845_v44  ;;  %v847_v1 = vrot.slane %v845_v44, 4  ;;  %v4650_v8 = vld [vmem:[%s4080_s11 + $0x1c] sm:$0xf]  ;;  %v3221_v16 = vld [vmem:[%s4080_s11 + $0x24] sm:$0xf] }
  0x82   : > { %3502 = vmatmul.mubr.msk.bf16.gmra.mrb[4].mxu0 %vm491_vm4, %v3170_v63  ;;  %v3062_v34 = vcombine.low %v4555_v4, %v4571_v17  ;;  %v4581_v32 = vsel %vm4393_vm7, %v3055_v30, %v852_v26  ;;  %v854_v22 = vrot.slane %v852_v26, 4  ;;  %v855_v63 = vrot.slane %v4319_v55, 5  ;;  %v3833_v26 = vld [vmem:[%s4080_s11 + $0x3c] sm:$0xff]   ;;  %v4693_v4 = vld [vmem:[%s4080_s11 + $0x2c] sm:$0x1] }
  0x83   : > { %3505 = vmatprep.mubr.msk.bf16.mxu0 %vm491_vm4, %v3171_v37  ;;  %v4590_v42 = vsel %vm4393_vm7, %v847_v1, %v848_v21  ;;  %v3056_v53 = vrot.slane %v788_v60, 9  ;;  %v859_v36 = vrot.slane %v4345_v12, 5  ;;  %v862_v59 = vrot.slane %v5061_v43, 5 }
  0x84   : > { %3434 = vmatmul.mubr.msk.bf16.gmra.mrb[8].mxu1 %vm491_vm4, %v3038_v56  ;;  %v811_v7 = vsel %vm4393_vm7, %v3049_v18, %v810_v39  ;;  %v824_v55 = vrot.slane %v4170_v23, 5  ;;  %v3063_v3 = vcombine.low %v4575_v49, %v4590_v42  ;;  %v4602_v15 = vsel %vm4393_vm7, %v854_v22, %v855_v63  ;;  %v3834_v22 = vld [vmem:[%s4080_s11 + $0x48] sm:$0xff]   ;;  %v4684_v63 = vld [vmem:[%s4080_s11 + $0x20] sm:$0x1] }
  0x85   : > { %3437 = vmatprep.mubr.msk.bf16.mxu1 %vm491_vm4, %v3039_v61  ;;  %v814_v56 = vsel %vm4393_vm7, %v812_v47, %v813_v57  ;;  %v3064_v27 = vcombine.low %v4581_v32, %v4602_v15  ;;  %v4612_v33 = vsel %vm4393_vm7, %v3056_v53, %v859_v36  ;;  %v861_v23 = vrot.slane %v859_v36, 4  ;;  %v3224_v36 = vld [vmem:[%s4080_s11 + $0x30] sm:$0xf] }
  0x86   : > { %v3040_v37 = vcombine.low %v5062_v13, %v4345_v12  ;;  %v1698_v9 = vsel %vm4393_vm7, %v3165_v52, %v1697_v58  ;;  %v3058_v57 = vcombine.low %v811_v7, %v814_v56  ;;  %v1701_v39 = vsel %vm4393_vm7, %v1699_v38, %v1700_v10 }
  0x87   : > { %v4619_v61 = vsel %vm4393_vm7, %v861_v23, %v862_v59  ;;  %v3051_v12 = vrot.slane %v783_v54, 9  ;;  %v826_v28 = vrot.slane %v824_v55, 4  ;;  %v827_v18 = vrot.slane %v5063_v29, 5  ;;  %v3835_v54 = vld [vmem:[%s4080_s11 + $0x54] sm:$0xff]   ;;  %v4714_v29 = vld [vmem:[%s4080_s11 + $0x40] sm:$0xf] }
  0x88   : > { %v3065_v51 = vcombine.low %v4612_v33, %v4619_v61  ;;  %v3174_v58 = vcombine.low %v1698_v9, %v1701_v39  ;;  %v1117_v48 = vsel %vm516_vm0, %v4470_v14, 0  ;;  %v2095_v25 = vshrl.u32 %v3218_v35, 16  ;;  %v4656_v14 = vld [vmem:[%s4080_s11 + $0x28] sm:$0xf]  ;;  %v3227_v39 = vld [vmem:[%s4080_s11 + $0x3c] sm:$0xf] }
  0x89   : > { %v825_v52 = vsel %vm4393_vm7, %v3051_v12, %v824_v55  ;;  %v2098_v38 = vshll.u32 %v3218_v35, 16  ;;  %v2337_v6 = vsel %vm516_vm0, %v4490_v0, 0  ;;  %v2104_v19 = vshll.u32 %v4650_v8, 16  ;;  %v3836_v12 = vld [vmem:[%s4080_s11 + $0x60] sm:$0xff]   ;;  %v3233_v61 = vld [vmem:[%s4080_s11 + $0x54] sm:$0xf] }
  0x8a   : > { %3506 = vmatmul.mubr.msk.bf16.gmra.mrb[8].mxu0 %vm491_vm4, %v3172_v2  ;;  %v3830_v2 = vld [vmem:[%s4080_s11 + $0x18] sm:$0xff]   ;;  %v2097_v0 = vrot.slane %v2095_v25, 4  ;;  %v2119_v20 = vshrl.u32 %v3221_v16, 16  ;;  %v2122_v44 = vshll.u32 %v3221_v16, 16  ;;  %v2128_v21 = vshll.u32 %v4656_v14, 16 }
  0x8b   : > { %3509 = vmatprep.mubr.msk.bf16.mxu0 %vm491_vm4, %v3173_v50  ;;  %v828_v50 = vsel %vm4393_vm7, %v826_v28, %v827_v18  ;;  %v2100_v47 = vrot.slane %v2098_v38, 5  ;;  %v2132_v30 = vshrl.u32 %v4656_v14, 16  ;;  %v4680_v60 = vrot.slane %v2104_v19, 5  ;;  %v4711_v28 = vld [vmem:[%s4080_s11 + $0x38] sm:$0x1] }
  0x8c   : > { %3438 = vmatmul.mubr.msk.bf16.gmra.mrb[12].mxu1 %vm491_vm4, %v3040_v37  ;;  %v3060_v10 = vcombine.low %v825_v52, %v828_v50  ;;  %v2121_v43 = vrot.slane %v2119_v20, 4  ;;  %v2124_v59 = vrot.slane %v2122_v44, 5  ;;  %v4687_v45 = vrot.slane %v2128_v21, 5  ;;  %v3230_v50 = vld [vmem:[%s4080_s11 + $0x48] sm:$0xf] }
  0x8d   : > { %3443 = vmatprep.mubr.msk.bf16.mxu1 %vm491_vm4, %v3058_v57  ;;  %v2101_v53 = vor.u32 %v2100_v47, %v2097_v0  ;;  %v2134_v11 = vrot.slane %v2132_v30, 4  ;;  %v2143_v7 = vshrl.u32 %v3224_v36, 16  ;;  %v2146_v55 = vshll.u32 %v3224_v36, 16 }
  0x8e   : > { %v2125_v37 = vor.u32 %v2124_v59, %v2121_v43  ;;  %v2138_v57 = vshll.u32 %v4693_v4, 16  ;;  %v2167_v42 = vshrl.u32 %v3227_v39, 16  ;;  %v2191_v25 = vshrl.u32 %v3230_v50, 16  ;;  %v3837_v59 = vld [vmem:[%s4080_s11 + $0x6c] sm:$0xff]  }
  0x8f   : > { %v2102_v13 = vrot.slane %v2101_v53, 4  ;;  %v2135_v9 = vor.u32 %v2134_v11, %v4687_v45  ;;  %v2148_v52 = vrot.slane %v2146_v55, 5  ;;  %v2194_v38 = vshll.u32 %v3230_v50, 16  ;;  %v4755_v53 = vld [vmem:[%s4080_s11 + $0x50] sm:$0x1] }
  0x90   : > { %v2126_v32 = vrot.slane %v2125_v37, 4  ;;  %v2162_v19 = vshll.u32 %v4711_v28, 16  ;;  %v2169_v44 = vrot.slane %v2167_v42, 4  ;;  %v2193_v36 = vrot.slane %v2191_v25, 4 }
  0x91   : > { %v2107_v35 = vsel %vm4125_vm3, %v2102_v13, %v4680_v60  ;;  %v2136_v15 = vrot.slane %v2135_v9, 4  ;;  %v2196_v43 = vrot.slane %v2194_v38, 5  ;;  %v2210_v9 = vshll.u32 %v4755_v53, 16 }
  0x92   : > { %3510 = vmatmul.mubr.msk.bf16.gmra.mrb[12].mxu0 %vm491_vm4, %v3174_v58  ;;  %v2131_v30 = vsel %vm4125_vm3, %v2126_v32, %v4687_v45  ;;  %v2164_v11 = vrot.slane %v2162_v19, 5  ;;  %vm3954_vm8 = vmmov 0   ;;  %vm3957_vm9 = vmmov (!%p3293_p0), 0  }
  0x93   : > { %3515 = vmatprep.mubr.msk.bf16.mxu0 %vm491_vm4, %v3830_v2  ;;  %v2145_v2 = vrot.slane %v2143_v7, 4  ;;  %v2197_v37 = vor.u32 %v2196_v43, %v2193_v36  ;;  %v2212_v38 = vrot.slane %v2210_v9, 5  ;;  %v4795_v36 = vld [vmem:[%s4080_s11 + $0x70] sm:$0xf]  ;;  %vm2909_vm10 = vcmask (!%p3293_p0), 1040384  }
  0x94   : > { %3444 = vmatmul.mubr.msk.bf16.vlgmr.msra.gmra.mrb[0].mxu1 %vm491_vm4, %v3059_v40  ;;  %v2108_v40 = vshrl.u32 %v4650_v8, 16  ;;  %v3841_v43 = vld [vmem:[%s4080_s11 + $0x30] sm:$0xff]  }
  0x95   : > { %3447 = vmatprep.mubr.msk.bf16.mxu1 %vm491_vm4, %v3060_v10  ;;  %3460 = vmatpush3.bf16.msra.mxu1 %v1117_v48  ;;  %v4724_v48 = vld [vmem:[%s4080_s11 + $0x4c] sm:$0xf]  ;;  %v2149_v47 = vor.u32 %v2148_v52, %v2145_v2  ;;  %v2218_v2 = vshll.u32 %v3233_v61, 16  ;;  %v2198_v25 = vrot.slane %v2197_v37, 4 }
  0x96   : > { %v2110_v1 = vrot.slane %v2108_v40, 4  ;;  %v2200_v40 = vshll.u32 %v4724_v48, 16  ;;  %v2204_v0 = vshrl.u32 %v4724_v48, 16 }
  0x97   : > { %v2220_v19 = vrot.slane %v2218_v2, 5 }
  0x98   : > { %v2111_v17 = vor.u32 %v2110_v1, %v4680_v60  ;;  %v4746_v60 = vld [vmem:[%s4080_s11 + $0x44] sm:$0x1]  ;;  %v2206_v33 = vrot.slane %v2204_v0, 4 }
  0x99   : > { %v2186_v55 = vshll.u32 %v4746_v60, 16 }
  0x9a   : > { %3516 = vmatmul.mubr.msk.bf16.vlgmr.msra.gmra.mrb[0].mxu0 %vm491_vm4, %v3831_v46  ;;  %v2112_v18 = vrot.slane %v2111_v17, 4  ;;  %v2176_v46 = vshll.u32 %v4714_v29, 16  ;;  %v4759_v17 = vrot.slane %v2200_v40, 5 }
  0x9b   : > { %3532 = vmatpush3.bf16.msra.mxu0 %v2337_v6  ;;  %3519 = vmatprep.mubr.msk.bf16.mxu0 %vm491_vm4, %v3832_v41  ;;  %v2180_v41 = vshrl.u32 %v4714_v29, 16  ;;  %v3838_v6 = vld [vmem:[%s4080_s11 + $0xc] sm:$0xff]  }
  0x9c   : > { %3743 = vmatprep.subr.msk.bf16.mxu0 %vm516_vm0, %v4661_v5  ;;  %3448 = vmatmul.mubr.msk.bf16.gmra.mrb[4].mxu1 %vm491_vm4, %v3061_v24  ;;  %v4690_v24 = vld [vmem:[%s4080_s11 + $0x34] sm:$0xf]  ;;  %v4752_v1 = vrot.slane %v2176_v46, 5 }
  0x9d   : > { %3451 = vmatprep.mubr.msk.bf16.mxu1 %vm491_vm4, %v3062_v34  ;;  %v2114_v34 = vshll.u32 %v4684_v63, 16  ;;  %v2152_v56 = vshll.u32 %v4690_v24, 16  ;;  %v2156_v23 = vshrl.u32 %v4690_v24, 16 }
  0x9f   : > { %v2116_v58 = vrot.slane %v2114_v34, 5  ;;  %v4721_v10 = vrot.slane %v2152_v56, 5  ;;  %v2158_v49 = vrot.slane %v2156_v23, 4  ;;  %v4764_v56 = vld [vmem:[%s4080_s11 + $0x58] sm:$0xf] }
  0xa0   : > { %v3839_v23 = vld [vmem:[%s4080_s11 + $0x18] sm:$0xff]   ;;  %v2224_v52 = vshll.u32 %v4764_v56, 16  ;;  %v2228_v50 = vshrl.u32 %v4764_v56, 16 }
  0xa1   : > { %v2117_v16 = vsel %vm4125_vm3, %v2112_v18, %v2116_v58  ;;  %v2159_v20 = vor.u32 %v2158_v49, %v4721_v10  ;;  %v3840_v18 = vld [vmem:[%s4080_s11 + $0x24] sm:$0xff]   ;;  %v2207_v58 = vor.u32 %v2206_v33, %v4759_v17 }
  0xa2   : > { %3520 = vmatmul.mubr.msk.bf16.gmra.mrb[4].mxu0 %vm491_vm4, %v3833_v26  ;;  %v3243_v45 = vcombine.low %v2107_v35, %v2117_v16  ;;  %v2188_v35 = vrot.slane %v2186_v55, 5  ;;  %v4789_v16 = vld [vmem:[%s4080_s11 + $0x5c] sm:$0x1]  ;;  %v2226_v40 = vrot.slane %v2224_v52, 5  ;;  %v2230_v0 = vrot.slane %v2228_v50, 4 }
  0xa3   : > { %3523 = vmatprep.mubr.msk.bf16.mxu0 %vm491_vm4, %v3834_v22  ;;  %v2182_v22 = vrot.slane %v2180_v41, 4  ;;  %v2160_v34 = vrot.slane %v2159_v20, 4  ;;  %v4805_v33 = vld [vmem:[%s4080_s11 + $0x68] sm:$0x1] }
  0xa4   : > { %3452 = vmatmul.mubr.msk.bf16.gmra.mrb[8].mxu1 %vm491_vm4, %v3063_v3  ;;  %v2170_v3 = vshll.u32 %v3227_v39, 16  ;;  %v3236_v39 = vld [vmem:[%s4080_s11 + $0x60] sm:$0xf]  ;;  %v2258_v9 = vshll.u32 %v4805_v33, 16 }
  0xa5   : > { %3455 = vmatprep.mubr.msk.bf16.mxu1 %vm491_vm4, %v3064_v27  ;;  %v2140_v27 = vrot.slane %v2138_v57, 5  ;;  %v2183_v13 = vor.u32 %v2182_v22, %v4752_v1  ;;  %v2215_v57 = vshrl.u32 %v3233_v61, 16  ;;  %v2165_v42 = vsel %vm4125_vm3, %v2160_v34, %v2164_v11 }
  0xa6   : > { %v2172_v21 = vrot.slane %v2170_v3, 5  ;;  %v2239_v32 = vshrl.u32 %v3236_v39, 16  ;;  %v2234_v11 = vshll.u32 %v4789_v16, 16  ;;  %v2203_v61 = vsel %vm4125_vm3, %v2198_v25, %v4759_v17 }
  0xa7   : > { %v2141_v26 = vsel %vm4125_vm3, %v2136_v15, %v2140_v27  ;;  %v2242_v15 = vshll.u32 %v3236_v39, 16  ;;  %v2184_v41 = vrot.slane %v2183_v13, 4  ;;  %v2276_v13 = vshrl.u32 %v4795_v36, 16 }
  0xa8   : > { %v2173_v7 = vor.u32 %v2172_v21, %v2169_v44  ;;  %v3239_v44 = vld [vmem:[%s4080_s11 + $0x6c] sm:$0xf]  ;;  %v2241_v21 = vrot.slane %v2239_v32, 4  ;;  %v4821_v32 = vld [vmem:[%s4080_s11 + $0x74] sm:$0x1] }
  0xa9   : > { %v2266_v55 = vshll.u32 %v3239_v44, 16 }
  0xaa   : > { %3524 = vmatmul.mubr.msk.bf16.gmra.mrb[8].mxu0 %vm491_vm4, %v3835_v54  ;;  %v3244_v54 = vcombine.low %v2131_v30, %v2141_v26  ;;  %v2174_v3 = vrot.slane %v2173_v7, 4  ;;  %v2244_v30 = vrot.slane %v2242_v15, 5  ;;  %v2231_v7 = vor.u32 %v2230_v0, %v2226_v40  ;;  %v3843_v15 = vld [vmem:[%s4080_s11 + $0x48] sm:$0xff]  }
  0xab   : > { %3527 = vmatprep.mubr.msk.bf16.mxu0 %vm491_vm4, %v3836_v12  ;;  %v4771_v12 = vld [vmem:[%s4080_s11 + $0x64] sm:$0xf]  ;;  %v2268_v52 = vrot.slane %v2266_v55, 5  ;;  %v2486_v0 = vrot.slane %v4650_v8, 5 }
  0xac   : > { %3456 = vmatmul.mubr.msk.bf16.gmra.mrb[12].mxu1 %vm491_vm4, %v3065_v51  ;;  %v2150_v51 = vrot.slane %v2149_v47, 4  ;;  %v2248_v27 = vshll.u32 %v4771_v12, 16  ;;  %v2252_v46 = vshrl.u32 %v4771_v12, 16  ;;  %v2591_v47 = vsel %vm516_vm0, %v4661_v5, 0  ;;  %v3842_v5 = vld [vmem:[%s4080_s11 + $0x3c] sm:$0xff]  }
  0xad   : > { %3461 = vmatprep.mubr.msk.bf16.mxu1 %vm491_vm4, %v3838_v6  ;;  %v2208_v6 = vrot.slane %v2207_v58, 4  ;;  %v2236_v58 = vrot.slane %v2234_v11, 5  ;;  %v2493_v11 = vrot.slane %v4656_v14, 5  ;;  %v2496_v14 = vrot.slane %v4693_v4, 5 }
  0xae   : > { %v2155_v49 = vsel %vm4125_vm3, %v2150_v51, %v4721_v10  ;;  %v2217_v10 = vrot.slane %v2215_v57, 4  ;;  %v2250_v26 = vrot.slane %v2248_v27, 5  ;;  %v2254_v22 = vrot.slane %v2252_v46, 4  ;;  %v3844_v46 = vld [vmem:[%s4080_s11 + $0x54] sm:$0xff]  }
  0xaf   : > { %v3245_v20 = vcombine.low %v2155_v49, %v2165_v42  ;;  %v2213_v51 = vsel %vm4125_vm3, %v2208_v6, %v2212_v38  ;;  %v2278_v49 = vrot.slane %v2276_v13, 4  ;;  %v2495_v55 = vrot.slane %v2493_v11, 4 }
  0xb0   : > { %v2221_v34 = vor.u32 %v2220_v19, %v2217_v10  ;;  %v2255_v37 = vor.u32 %v2254_v22, %v2250_v26  ;;  %v3247_v57 = vcombine.low %v2203_v61, %v2213_v51  ;;  %v2282_v10 = vshll.u32 %v4821_v32, 16 }
  0xb1   : > { %v2500_v51 = vrot.slane %v4690_v24, 5 }
  0xb2   : > { %3528 = vmatmul.mubr.msk.bf16.gmra.mrb[12].mxu0 %vm491_vm4, %v3837_v59  ;;  %v2179_v59 = vsel %vm4125_vm3, %v2174_v3, %v4752_v1  ;;  %v2263_v1 = vshrl.u32 %v3239_v44, 16  ;;  %v2222_v39 = vrot.slane %v2221_v34, 4  ;;  %v2256_v3 = vrot.slane %v2255_v37, 4  ;;  %v3261_v34 = vld [vmem:[%s4080_s11 + $0x30] sm:$0xe] }
  0xb3   : > { %3533 = vmatprep.mubr.msk.bf16.mxu0 %vm491_vm4, %v3243_v45  ;;  %v2189_v45 = vsel %vm4125_vm3, %v2184_v41, %v2188_v35  ;;  %v2260_v35 = vrot.slane %v2258_v9, 5  ;;  %v2502_v13 = vrot.slane %v2500_v51, 4  ;;  %v2497_v37 = vsel %vm4393_vm7, %v2495_v55, %v2496_v14 }
  0xb4   : > { %3462 = vmatmul.mubr.msk.bf16.vlgmr.msra.gmra.mrb[0].mxu1 %vm491_vm4, %v3839_v23  ;;  %v2272_v23 = vshll.u32 %v4795_v36, 16  ;;  %v3246_v17 = vcombine.low %v2179_v59, %v2189_v45  ;;  %v2265_v2 = vrot.slane %v2263_v1, 4  ;;  %v2227_v27 = vsel %vm4125_vm3, %v2222_v39, %v2226_v40  ;;  %v3259_v40 = vld [vmem:[%s4080_s11 + $0x18] sm:$0xe]  ;;  %v3845_v59 = vld [vmem:[%s4080_s11 + $0x60] sm:$0xff]  }
  0xb5   : > { %3465 = vmatprep.mubr.msk.bf16.mxu1 %vm491_vm4, %v3840_v18  ;;  %v2232_v18 = vrot.slane %v2231_v7, 4  ;;  %v2261_v19 = vsel %vm4125_vm3, %v2256_v3, %v2260_v35  ;;  %v3267_v22 = vrot.slane %v3259_v40, 9  ;;  %v2507_v9 = vrot.slane %v4714_v29, 5  ;;  %v3263_v39 = vld [vmem:[%s4080_s11 + $0x48] sm:$0xe] }
  0xb6   : > { %v2274_v50 = vrot.slane %v2272_v23, 5  ;;  %v2269_v25 = vor.u32 %v2268_v52, %v2265_v2  ;;  %v3269_v23 = vrot.slane %v3261_v34, 9  ;;  %v2521_v35 = vrot.slane %v4764_v56, 5 }
  0xb7   : > { %v2237_v41 = vsel %vm4125_vm3, %v2232_v18, %v2236_v58  ;;  %v2509_v52 = vrot.slane %v2507_v9, 4  ;;  %v2531_v56 = vrot.slane %v4805_v33, 5 }
  0xb8   : > { %v2279_v38 = vor.u32 %v2278_v49, %v2274_v50  ;;  %v2270_v44 = vrot.slane %v2269_v25, 4  ;;  %v3271_v49 = vrot.slane %v3263_v39, 9 }
  0xba   : > { %3534 = vmatmul.mubr.msk.bf16.vlgmr.msra.gmra.mrb[0].mxu0 %vm491_vm4, %v3244_v54  ;;  %v2245_v54 = vor.u32 %v2244_v30, %v2241_v21  ;;  %v2280_v21 = vrot.slane %v2279_v38, 4  ;;  %v2284_v30 = vrot.slane %v2282_v10, 5  ;;  %v2275_v8 = vsel %vm4125_vm3, %v2270_v44, %v2274_v50  ;;  %v3266_v44 = vld [vmem:[%s4080_s11 + $0x6c] sm:$0xe] }
  0xbb   : > { %3550 = vmatpush3.bf16.msra.mxu0 %v2591_v47  ;;  %3537 = vmatprep.mubr.msk.bf16.mxu0 %vm491_vm4, %v3245_v20  ;;  %v3248_v47 = vcombine.low %v2227_v27, %v2237_v41  ;;  %v2510_v50 = vrot.slane %v4746_v60, 5  ;;  %v3264_v27 = vld [vmem:[%s4080_s11 + $0x54] sm:$0xe]  ;;  %v2523_v10 = vrot.slane %v2521_v35, 4 }
  0xbc   : > { %3466 = vmatmul.mubr.msk.bf16.gmra.mrb[4].mxu1 %vm491_vm4, %v3841_v43  ;;  %v2246_v42 = vrot.slane %v2245_v54, 4  ;;  %v2488_v43 = vrot.slane %v2486_v0, 4  ;;  %v2285_v45 = vsel %vm4125_vm3, %v2280_v21, %v2284_v30  ;;  %v2503_v54 = vrot.slane %v4711_v28, 5 }
  0xbd   : > { %3469 = vmatprep.mubr.msk.bf16.mxu1 %vm491_vm4, %v3842_v5  ;;  %v2487_v5 = vsel %vm4393_vm7, %v3267_v22, %v2486_v0  ;;  %v3250_v7 = vcombine.low %v2275_v8, %v2285_v45  ;;  %v2514_v28 = vrot.slane %v4724_v48, 5  ;;  %v2511_v3 = vsel %vm4393_vm7, %v2509_v52, %v2510_v50 }
  0xbe   : > { %v2251_v6 = vsel %vm4125_vm3, %v2246_v42, %v2250_v26  ;;  %v2489_v26 = vrot.slane %v4684_v63, 5  ;;  %v3260_v63 = vld [vmem:[%s4080_s11 + $0x24] sm:$0xe]  ;;  %v2504_v4 = vsel %vm4393_vm7, %v2502_v13, %v2503_v54  ;;  %v2517_v42 = vrot.slane %v4755_v53, 5 }
  0xbf   : > { %v3249_v20 = vcombine.low %v2251_v6, %v2261_v19  ;;  %v3268_v31 = vrot.slane %v3260_v63, 9  ;;  %v2516_v29 = vrot.slane %v2514_v28, 4  ;;  %v2528_v53 = vrot.slane %v4771_v12, 5 }
  0xc0   : > { %v2490_v61 = vsel %vm4393_vm7, %v2488_v43, %v2489_v26  ;;  %v3272_v38 = vrot.slane %v3264_v27, 9  ;;  %v2524_v6 = vrot.slane %v4789_v16, 5  ;;  %v3274_v30 = vrot.slane %v3266_v44, 9 }
  0xc1   : > { %v3276_v1 = vcombine.low %v2487_v5, %v2490_v61  ;;  %v2494_v24 = vsel %vm4393_vm7, %v3268_v31, %v2493_v11  ;;  %v2518_v60 = vsel %vm4393_vm7, %v2516_v29, %v2517_v42  ;;  %v2530_v0 = vrot.slane %v2528_v53, 4 }
  0xc2   : > { %3538 = vmatmul.mubr.msk.bf16.gmra.mrb[4].mxu0 %vm491_vm4, %v3246_v17  ;;  %v2501_v17 = vsel %vm4393_vm7, %v3269_v23, %v2500_v51  ;;  %v3277_v18 = vcombine.low %v2494_v24, %v2497_v37  ;;  %v2522_v40 = vsel %vm4393_vm7, %v3272_v38, %v2521_v35  ;;  %v2525_v12 = vsel %vm4393_vm7, %v2523_v10, %v2524_v6  ;;  %v4924_v24 = vld [vmem:[%s5038_s2] ss:$0 sm:$0xff] }
  0xc3   : > { %3541 = vmatprep.mubr.msk.bf16.mxu0 %vm491_vm4, %v3247_v57  ;;  %v3262_v57 = vld [vmem:[%s4080_s11 + $0x3c] sm:$0xe]  ;;  %v3278_v58 = vcombine.low %v2501_v17, %v2504_v4  ;;  %v2532_v16 = vsel %vm4393_vm7, %v2530_v0, %v2531_v56  ;;  %v3281_v33 = vcombine.low %v2522_v40, %v2525_v12  ;;  %v2538_v43 = vrot.slane %v4821_v32, 5 }
  0xc4   : > { %3470 = vmatmul.mubr.msk.bf16.gmra.mrb[8].mxu1 %vm491_vm4, %v3843_v15  ;;  %v3270_v2 = vrot.slane %v3262_v57, 9  ;;  %v2515_v15 = vsel %vm4393_vm7, %v3271_v49, %v2514_v28  ;;  %v3953_v8 = vmov 0.0  }
  0xc5   : > { %3473 = vmatprep.mubr.msk.bf16.mxu1 %vm491_vm4, %v3844_v46  ;;  %v3265_v46 = vld [vmem:[%s4080_s11 + $0x60] sm:$0xe]  ;;  %v3280_v25 = vcombine.low %v2515_v15, %v2518_v60  ;;  %3567 = vmatprep.subr.bf16.mxu1 %v3953_v8 }
  0xc6   : > { %v2508_v48 = vsel %vm4393_vm7, %v3270_v2, %v2507_v9  ;;  %v3273_v19 = vrot.slane %v3265_v46, 9 }
  0xc7   : > { %v3279_v41 = vcombine.low %v2508_v48, %v2511_v3 }
  0xca   : > { %3542 = vmatmul.mubr.msk.bf16.gmra.mrb[8].mxu0 %vm491_vm4, %v3248_v47  ;;  %v2535_v47 = vrot.slane %v4795_v36, 5 }
  0xcb   : > { %3545 = vmatprep.mubr.msk.bf16.mxu0 %vm491_vm4, %v3249_v20  ;;  %v2529_v20 = vsel %vm4393_vm7, %v3273_v19, %v2528_v53 }
  0xcc   : > { %3474 = vmatmul.mubr.msk.bf16.gmra.mrb[12].mxu1 %vm491_vm4, %v3845_v59  ;;  %v3282_v21 = vcombine.low %v2529_v20, %v2532_v16  ;;  %v2537_v22 = vrot.slane %v2535_v47, 4  ;;  %v2536_v36 = vsel %vm4393_vm7, %v3274_v30, %v2535_v47 }
  0xcd   : > { %3583 = vmatprep.mubr.msk.bf16.mxu1 %vm3954_vm8, %v3953_v8 }
  0xce   : > { %v2539_v26 = vsel %vm4393_vm7, %v2537_v22, %v2538_v43 }
  0xcf   : > { %v3283_v59 = vcombine.low %v2536_v36, %v2539_v26 }
  0xd2   : > { %3546 = vmatmul.mubr.msk.bf16.gmra.mrb[12].mxu0 %vm491_vm4, %v3250_v7 }
  0xd3   : > { %3551 = vmatprep.mubr.msk.bf16.mxu0 %vm491_vm4, %v3276_v1 }
  0xda   : > { %3552 = vmatmul.mubr.msk.bf16.vlgmr.msra.gmra.mrb[0].mxu0 %vm491_vm4, %v3277_v18 }
  0xdb   : > { %3555 = vmatprep.mubr.msk.bf16.mxu0 %vm491_vm4, %v3278_v58 }
  0xe2   : > { %3556 = vmatmul.mubr.msk.bf16.gmra.mrb[4].mxu0 %vm491_vm4, %v3279_v41 }
  0xe3   : > { %3559 = vmatprep.mubr.msk.bf16.mxu0 %vm491_vm4, %v3280_v25 }
  0xea   : > { %3560 = vmatmul.mubr.msk.bf16.gmra.mrb[8].mxu0 %vm491_vm4, %v3281_v33 }
  0xeb   : > { %3563 = vmatprep.mubr.msk.bf16.mxu0 %vm491_vm4, %v3282_v21 }
  0xf2   : > { %3564 = vmatmul.mubr.msk.bf16.gmra.mrb[12].mxu0 %vm491_vm4, %v3283_v59 }
 0x187   : > { %v3463_v32 = vpop.f32.mrb[0].mxu1 }
 0x188   : > { %v1153_v45 = vpop.f32.mrb[1].mxu1 }
 0x189   : > { %v3464_v11 = vpop.f32.mrb[2].mxu1 }
 0x18a   : > { %v1156_v5 = vpop.f32.mrb[3].mxu1 }
 0x18f   : > { %v3467_v61 = vpop.f32.mrb[4].mxu1 }
 0x190   : > { %v1169_v63 = vpop.f32.mrb[5].mxu1 }
 0x191   : > { %v3468_v51 = vpop.f32.mrb[6].mxu1 }
 0x192   : > { %v1172_v34 = vpop.f32.mrb[7].mxu1 }
 0x197   : > { %v3471_v7 = vpop.f32.mrb[8].mxu1 }
 0x198   : > { %v1185_v62 = vpop.f32.mrb[9].mxu1 }
 0x199   : > { %v3472_v1 = vpop.f32.mrb[10].mxu1 }
 0x19a   : > { %v1188_v31 = vpop.f32.mrb[11].mxu1 }
 0x19f   : > { %v4913_v55 = vpop.f32.mrb[12].mxu1 }
 0x1a0   : > { %v4915_v14 = vpop.f32.mrb[13].mxu1 }
 0x1a1   : > { %v4917_v23 = vpop.f32.mrb[14].mxu1 }
 0x1a2   : > { %v4919_v13 = vpop.f32.mrb[15].mxu1 }
 0x1ad   : > { %v3553_v54 = vpop.f32.mrb[0].mxu0 }
 0x1ae   : > { %v3607_v37 = vadd.f32 %v3553_v54, %v3463_v32  ;;  %v2627_v9 = vpop.f32.mrb[1].mxu0 }
 0x1af   : > { %v3608_v17 = vadd.f32 %v2627_v9, %v1153_v45  ;;  %v3554_v4 = vpop.f32.mrb[2].mxu0 }
 0x1b0   : > { %v2715_v57 = vadd.f32 %v3607_v37, %v4924_v24  ;;  %v3609_v28 = vadd.f32 %v3554_v4, %v3464_v11  ;;  %v2630_v39 = vpop.f32.mrb[3].mxu0 }
 0x1b1   : > { %v2713_v18 = vadd.f32 %v3608_v17, %v4924_v24  ;;  %v3610_v58 = vadd.f32 %v2630_v39, %v1156_v5 }
 0x1b2   : > { %v2716_v2 = vadd.f32 %v3609_v28, %v4924_v24  ;;  %v2731_v50 = vmax.f32 %v2715_v57, 0.0 }
 0x1b3   : > { %v2714_v52 = vadd.f32 %v3610_v58, %v4924_v24  ;;  %v2729_v29 = vmax.f32 %v2713_v18, 0.0 }
 0x1b4   : > { %v2732_v49 = vmax.f32 %v2716_v2, 0.0 }
 0x1b5   : > { %v2730_v42 = vmax.f32 %v2714_v52, 0.0  ;;  %v3557_v48 = vpop.f32.mrb[4].mxu0  ;;  %v2745_v52 = vld [vmem:[#allocation2] sm:$0x1] }
 0x1b6   : > { %v2747_v3 = vpack.c.bf16 %v2732_v49, %v2731_v50  ;;  %v3611_v35 = vadd.f32 %v3557_v48, %v3467_v61  ;;  %v2643_v15 = vpop.f32.mrb[5].mxu0  ;;  %v3846_v48 = vld [vmem:[%s5039_s3] sm:$0xff] (!%p3293_p0)  }
 0x1b7   : > { %v2746_v60 = vpack.c.bf16 %v2730_v42, %v2729_v29  ;;  %v3612_v27 = vadd.f32 %v2643_v15, %v1169_v63  ;;  %v3558_v53 = vpop.f32.mrb[6].mxu0  ;;  %v3849_v15 = vld [vmem:[%s5039_s3 + $0x18] sm:$0xff] (!%p3293_p0)  }
 0x1b8   : > { %v2719_v46 = vadd.f32 %v3611_v35, %v4924_v24  ;;  %v3613_v41 = vadd.f32 %v3558_v53, %v3468_v51  ;;  %v2646_v25 = vpop.f32.mrb[7].mxu0  ;;  %v3848_v35 = vld [vmem:[%s5039_s3 + $0x10] sm:$0xff] (!%p3293_p0)  }
 0x1b9   : > { %v2717_v38 = vadd.f32 %v3612_v27, %v4924_v24  ;;  %v3614_v10 = vadd.f32 %v2646_v25, %v1172_v34  ;;  %3568 = vmatpush3.bf16.msra.mxu1 %v2746_v60  ;;  %v3850_v60 = vld [vmem:[%s5039_s3 + $0x20] sm:$0xff] (!%p3293_p0)   ;;  %v3851_v27 = vld [vmem:[%s5039_s3 + $0x28] sm:$0xff] (!%p3293_p0)   ;;  %v3852_v53 = vld [vmem:[%s5039_s3 + $0x30] sm:$0xff] (!%p3293_p0)  }
 0x1ba   : > { %v2720_v6 = vadd.f32 %v3613_v41, %v4924_v24  ;;  %3569 = vmatprep.subr.bf16.mxu1 %v3953_v8  ;;  %v2735_v0 = vmax.f32 %v2719_v46, 0.0  ;;  %v3853_v25 = vld [vmem:[%s5039_s3 + $0x38] sm:$0xff] (!%p3293_p0)  }
 0x1bb   : > { %v2718_v19 = vadd.f32 %v3614_v10, %v4924_v24  ;;  %v2733_v40 = vmax.f32 %v2717_v38, 0.0  ;;  %v2819_v10 = vld [vmem:[%s5040_s4] sm:$0x1] (!%p3293_p0) }
 0x1bc   : > { %v2736_v56 = vmax.f32 %v2720_v6, 0.0 }
 0x1bd   : > { %v2734_v12 = vmax.f32 %v2718_v19, 0.0  ;;  %v3561_v47 = vpop.f32.mrb[8].mxu0  ;;  %3570 = vmatpush3.bf16.msra.mxu1 %v2747_v3  ;;  %v3956_v3 = vmov (!%p3293_p0), 0.0  }
 0x1be   : > { %v2749_v20 = vpack.c.bf16 %v2736_v56, %v2735_v0  ;;  %v3615_v16 = vadd.f32 %v3561_v47, %v3471_v7  ;;  %v2659_v44 = vpop.f32.mrb[9].mxu0  ;;  %3571 = vmatprep.subr.bf16.mxu1 %v3953_v8  ;;  %3587 = vmatprep.subr.bf16.mxu0 (!%p3293_p0), %v3956_v3 }
 0x1bf   : > { %v2748_v33 = vpack.c.bf16 %v2734_v12, %v2733_v40  ;;  %v3616_v21 = vadd.f32 %v2659_v44, %v1185_v62  ;;  %v3562_v30 = vpop.f32.mrb[10].mxu0  ;;  %3588 = vmatpush3.bf16.msra.mxu0 (!%p3293_p0), %v3846_v48  ;;  %3603 = vmatprep.mubr.msk.bf16.mxu0 (!%p3293_p0), %vm3957_vm9, %v3956_v3 }
 0x1c0   : > { %v2723_v22 = vadd.f32 %v3615_v16, %v4924_v24  ;;  %v3617_v43 = vadd.f32 %v3562_v30, %v3472_v1  ;;  %v2662_v36 = vpop.f32.mrb[11].mxu0  ;;  %3589 = vmatprep.subr.bf16.mxu0 (!%p3293_p0), %v3956_v3 }
 0x1c1   : > { %v2721_v26 = vadd.f32 %v3616_v21, %v4924_v24  ;;  %v3618_v59 = vadd.f32 %v2662_v36, %v1188_v31  ;;  %3572 = vmatpush3.bf16.msra.mxu1 %v2748_v33 }
 0x1c2   : > { %v2724_v32 = vadd.f32 %v3617_v43, %v4924_v24  ;;  %3573 = vmatprep.subr.bf16.mxu1 %v3953_v8  ;;  %v2739_v11 = vmax.f32 %v2723_v22, 0.0 }
 0x1c3   : > { %v2722_v45 = vadd.f32 %v3618_v59, %v4924_v24  ;;  %v2737_v61 = vmax.f32 %v2721_v26, 0.0 }
 0x1c4   : > { %v2740_v5 = vmax.f32 %v2724_v32, 0.0 }
 0x1c5   : > { %v2738_v63 = vmax.f32 %v2722_v45, 0.0  ;;  %v3565_v51 = vpop.f32.mrb[12].mxu0  ;;  %3574 = vmatpush3.bf16.msra.mxu1 %v2749_v20 }
 0x1c6   : > { %v2751_v34 = vpack.c.bf16 %v2740_v5, %v2739_v11  ;;  %v3619_v7 = vadd.f32 %v3565_v51, %v4913_v55  ;;  %v2675_v62 = vpop.f32.mrb[13].mxu0  ;;  %3575 = vmatprep.subr.bf16.mxu1 %v3953_v8 }
 0x1c7   : > { %v2750_v1 = vpack.c.bf16 %v2738_v63, %v2737_v61  ;;  %v3620_v31 = vadd.f32 %v2675_v62, %v4915_v14  ;;  %v3566_v54 = vpop.f32.mrb[14].mxu0 }
 0x1c8   : > { %v2727_v37 = vadd.f32 %v3619_v7, %v4924_v24  ;;  %v3621_v9 = vadd.f32 %v3566_v54, %v4917_v23  ;;  %v2678_v17 = vpop.f32.mrb[15].mxu0 }
 0x1c9   : > { %v2725_v4 = vadd.f32 %v3620_v31, %v4924_v24  ;;  %v3622_v57 = vadd.f32 %v2678_v17, %v4919_v13  ;;  %3576 = vmatpush3.bf16.msra.mxu1 %v2750_v1  ;;  %v3955_v13 = vmov 1065369472  }
 0x1ca   : > { %v2728_v28 = vadd.f32 %v3621_v9, %v4924_v24  ;;  %3577 = vmatprep.subr.bf16.mxu1 %v3953_v8  ;;  %v2743_v39 = vmax.f32 %v2727_v37, 0.0 }
 0x1cb   : > { %v2726_v55 = vadd.f32 %v3622_v57, %v4924_v24  ;;  %v2741_v14 = vmax.f32 %v2725_v4, 0.0 }
 0x1cc   : > { %v2744_v18 = vmax.f32 %v2728_v28, 0.0 }
 0x1cd   : > { %v2742_v58 = vmax.f32 %v2726_v55, 0.0  ;;  %3578 = vmatpush3.bf16.msra.mxu1 %v2751_v34 }
 0x1ce   : > { %v2753_v2 = vpack.c.bf16 %v2744_v18, %v2743_v39  ;;  %3579 = vmatprep.subr.bf16.mxu1 %v3953_v8 }
 0x1cf   : > { %v2752_v23 = vpack.c.bf16 %v2742_v58, %v2741_v14 }
 0x1d1   : > { %3580 = vmatpush3.bf16.msra.mxu1 %v2752_v23 }
 0x1d2   : > { %3581 = vmatprep.subr.bf16.mxu1 %v3953_v8  ;;  %v3847_v8 = vld [vmem:[%s5039_s3 + $0x8] sm:$0xff] (!%p3293_p0)  }
 0x1d3   : > { %3590 = vmatpush3.bf16.msra.mxu0 (!%p3293_p0), %v3847_v8 }
 0x1d4   : > { %3591 = vmatprep.subr.bf16.mxu0 (!%p3293_p0), %v3956_v3 }
 0x1d5   : > { %3582 = vmatpush3.bf16.msra.mxu1 %v2753_v2 }
 0x1d7   : > { %3592 = vmatpush3.bf16.msra.mxu0 (!%p3293_p0), %v3848_v35 }
 0x1d8   : > { %3584 = vmatmul.mubr.bf16.vlgmr.msra.gmra.mrb[16].mxu1 %v3955_v13  ;;  %3593 = vmatprep.subr.bf16.mxu0 (!%p3293_p0), %v3956_v3 }
 0x1db   : > { %3594 = vmatpush3.bf16.msra.mxu0 (!%p3293_p0), %v3849_v15 }
 0x1dc   : > { %3595 = vmatprep.subr.bf16.mxu0 (!%p3293_p0), %v3956_v3 }
 0x1df   : > { %3596 = vmatpush3.bf16.msra.mxu0 (!%p3293_p0), %v3850_v60 }
 0x1e0   : > { %3597 = vmatprep.subr.bf16.mxu0 (!%p3293_p0), %v3956_v3 }
 0x1e3   : > { %3598 = vmatpush3.bf16.msra.mxu0 (!%p3293_p0), %v3851_v27 }
 0x1e4   : > { %3599 = vmatprep.subr.bf16.mxu0 (!%p3293_p0), %v3956_v3 }
 0x1e7   : > { %3600 = vmatpush3.bf16.msra.mxu0 (!%p3293_p0), %v3852_v53 }
 0x1e8   : > { %3601 = vmatprep.subr.bf16.mxu0 (!%p3293_p0), %v3956_v3 }
 0x1eb   : > { %3602 = vmatpush3.bf16.msra.mxu0 (!%p3293_p0), %v3853_v25 }
 0x2a8   : > { %2799 = sbr.rel (%p3293_p0) target bundleno = 1073 (0x431), region = 48 }
 0x2ab   : > { %v2788_v50 = vpop.f32.mrb[16].mxu1 }
 0x2ac   : > { %v2794_v49 = vadd.f32 %v2788_v50, %v2745_v52  ;;  %v3585_v29 = vpop.f32.mrb[17].mxu1 }
 0x2ad   : > { %v2791_v24 = vpop.f32.mrb[18].mxu1 }
 0x2ae   : > { %2795 = vst [vmem:[#allocation2] sm:$0x1] %v2794_v49  ;;  %v3586_v42 = vpop.f32.mrb[19].mxu1 }
 0x2b5   : > { %v2800_v46 = vld [vmem:[#allocation2] sm:$0x1] }
 0x2b6   : > { %v2801_v41 = vmul.f32 0.00390625, %v2800_v46 }
 0x2b8   : > { %v2802_v38 = vpack.c.bf16 %v2801_v41, %v2801_v41 }
 0x2ba   : > { %3604 = vmatmul.mubr.bf16.vlgmr.msra.gmra.mrb[0].mxu0 %v2802_v38 }
 0x38d   : > { %v2902_v6 = vpop.f32.mrb[0].mxu0 }
 0x38e   : > { %v2903_v19 = vadd.f32 %v2902_v6, %v2819_v10  ;;  %v3605_v0 = vpop.f32.mrb[1].mxu0 }
 0x38f   : > { %v2905_v56 = vpop.f32.mrb[2].mxu0 }
 0x390   : > { %v3606_v40 = vpop.f32.mrb[3].mxu0  ;;  %v2908_v12 = vmul.f32 %v2903_v19, %v2903_v19 }
 0x392   : > { %v2910_v47 = vsel %vm2909_vm10, %v2908_v12, 0.0 }
 0x393   : > { %2911 = vadd.xlane.f32.xlu0 %v2910_v47 }
 0x420   : > { %v2912_v20 = vpop.xlane.xlu0 %2911 }
 0x421   : > { %v2913_v16 = vmax.f32 %v2912_v20, 1e-24 }
 0x423   : > { %3854 = vrsqrt.f32 %v2913_v16 }
 0x42d   : > { %v3855_v44 = vpop.eup %3854 }
 0x42e   : > { %v2915_v33 = vmul.f32 %v3855_v44, %v2903_v19 }
 0x430   : > { %2916 = vst [vmem:[%s4066_s16] sm:$0x1] %v2915_v33 }
 0x431 PF: > { %s3302_s17 = sshll.u32 %s3938_s22, 4  ;;  %s2930_s27 = sshll.u32 %s4066_s16, 4  ;;  %s2931_s27 = int_to_ptr.vmem [resolvable:$true] %s2930_s27 }
 0x432   : > { %s4986_s26 = scalar_lea.hbm %s5041_s5, %s3302_s17  ;;  %s2918_s7 = scalar_lea.sflag [#allocation4], %s227_s10 }
 0x433   : > { %s3856_s8 = scalar_lea.vmem %s2931_s27, 16  ;;  %s3958_s12 = smov [#allocation3]  }
 0x434   : > { %p3857_p1 = scmp.ne.s32.totalorder %s2931_s27, %s3856_s8  ;;  %s3860_s13 = sshll.u32 %s3958_s12, 4  ;;  %s3861_s13 = int_to_ptr.vmem [resolvable:$false] %s3860_s13 }
 0x435   : > { %s3862_s14 = scalar_lea.vmem %s3861_s13, 32  ;;  %p3863_p5 = scmp.lt.s32.totalorder %s2931_s27, %s3861_s13 }
 0x436   : > { %p3858_p2 = pnand %p3857_p1, %p4038_p3  ;;  %p3864_p6 = scmp.lt.s32.totalorder %s3862_s14, %s3856_s8 }
 0x438   : > { %p3859_p4 = pneg %p3858_p2  ;;  %p3865_p7 = por %p3864_p6, %p3863_p5 }
 0x43a   : > { %p3866_p8 = pnand %p3865_p7, %p3859_p4 }
 0x43c   : > { %3869 = shalt.err (!%p3866_p8)
}
 0x43d   : > { %s3870_s22 = scalar_lea.hbm %s4986_s26, 16  ;;  %s3874_s21 = scalar_lea.hbm %s5041_s5, 32 }
 0x43e   : > { %p3871_p10 = scmp.ne.s32.totalorder %s4986_s26, %s3870_s22  ;;  %p3875_p13 = scmp.lt.u32.totalorder %s4986_s26, %s5041_s5 }
 0x43f   : > { %p3876_p0 = scmp.lt.u32.totalorder %s3874_s21, %s3870_s22  ;;  %p3878_p2 = scmp.lt.u32.totalorder %s3870_s22, %s4986_s26 }
 0x440   : > { %p3872_p11 = pnand %p3871_p10, %p4038_p3 }
 0x441   : > { %p3877_p1 = por %p3876_p0, %p3875_p13 }
 0x442   : > { %p3873_p12 = pneg %p3872_p11 }
 0x443   : > { %p3879_p4 = por %p3878_p2, %p3877_p1 }
 0x445   : > { %p3880_p5 = pnand %p3879_p4, %p3873_p12 }
 0x447   : > { %3883 = shalt.err (!%p3880_p5)
}
 0x448   : > { %3745 = dma.vmem_to_hbm [thread:$0]  (%p4038_p3), %s2931_s27, 16, %s4986_s26, %s2918_s7  }
 0x449 PF: > { %p3751_p6 = scmp.ge.s32.totalorder %s3950_s25, 2  ;;  %s2942_s11 = sand.u32 1, %s3922_s18  }
 0x44a   : > { %s2943_s8 = scalar_lea.sflag [#allocation4], %s2942_s11 }
 0x44b   : > { %p3748_p7 = pnand %p3751_p6, %p4048_p9 }
 0x44d   : > { %3917 = dma.done.wait (!%p3748_p7), %s2943_s8, 16  }
 0x44e   : > { %3919 = vsyncadd (!%p3748_p7), %s2943_s8, 4294967280  ;;  %s18_s25 = sadd.s32 1, %s3950_s25   ;;  %s5064_s18 = smov %s3926_s19 }
 0x44f   : > { %p15_p8 = scmp.ge.s32.totalorder %s18_s25, 6   ;;  %s5065_s19 = smov %s3930_s20 }
 0x450   : > { %s5066_s20 = smov %s4056_s9  ;;  %s5067_s21 = smov %s3942_s23 }
 0x451   : > { %s5068_s22 = smov %s3946_s24  ;;  %s5069_s23 = smov %s5072_s28 }
 0x452   : > { %s5070_s24 = smov %s5076_s29  ;;  %17 = sbr.rel (!%p15_p8) target bundleno = 5 (0x5), region = 94 }
 0x459   :  { %2947 = vsyncpa [#allocation4], 1 }
 0x45a   :  { %2949 = vsyncpa [#allocation4 + $0x1], 1 }

</bundles_post_ra>
